<compile_context>
chip_gen: v5e
topology: v5e:2x2
jax: 0.10.0
libtpu: 0.0.40
codegen_flags: <defaults>
</compile_context>

<pallas_src>
import functools

import jax
import jax.numpy as jnp
import numpy as np
from jax.experimental import pallas as pl
from jax.experimental.pallas import tpu as pltpu

# ---------------- model hyper-parameters (small, consistent with the module) -------------
VOCAB_NUM = 50
PAD_IDX = 0
MAX_LEN = 32
D_MODEL = 128
D_EMBEDDING = 64
N_HEAD = 4
HEAD_DIM = D_MODEL // N_HEAD
DIM_FEEDFORWARD = 256
N_LAYERS = 2
LN_EPS = 1e-5
OUT_PAD = 128          # lane-dense padding of the 3-wide output head


# ---------------- shared math helpers (used inside the kernel) ----------------------------
def _gelu(x):
    # exact (erf) GELU, matching torch.nn.functional.gelu default
    return 0.5 * x * (1.0 + jax.lax.erf(x * 0.7071067811865476))


def _layer_norm(x, g, b, eps=LN_EPS):
    mu = jnp.mean(x, axis=-1, keepdims=True)
    var = jnp.mean(jnp.square(x - mu), axis=-1, keepdims=True)
    return (x - mu) * jax.lax.rsqrt(var + eps) * g + b


# ---------------- fused Pallas kernel ------------------------------------------------------
def fused_transformer_kernel(
    x_ref, mask_ref,
    wqkv_ref, bqkv_ref, wo_ref, bo_ref,
    w1_ref, b1_ref, w2_ref, b2_ref,
    g1_ref, be1_ref, g2_ref, be2_ref,
    ow1_ref, og_ref, ob_ref, ow2_ref, ob2_ref,
    out_ref, *, n_head, n_layers,
):
    """N encoder layers (shared MHA weights) + output head for one batch tile, VMEM-resident."""
    TB, S, D = x_ref.shape
    hd = D // n_head
    M = TB * S
    BH = TB * n_head

    x = x_ref[...].reshape(M, D)                       # (M, D) f32 activations

    # Hoisted mask: materialize the full additive mask ONCE, head-major batch order
    # (index = h*TB + b) to match the stacked Q/K/V below.
    mask_full = jnp.broadcast_to(
        mask_ref[...].reshape(1, TB, 1, S), (n_head, TB, S, S)
    ).reshape(BH, S, S)                                 # (BH, S, S) f32

    wqkv = wqkv_ref[...]                                # (D, 3D) bf16, 1/sqrt(hd) folded into Q block
    bqkv = bqkv_ref[...]                                # (1, 3D) f32
    wo = wo_ref[...]                                    # (D, D)  bf16
    bo = bo_ref[...]                                    # (1, D)  f32

    def split_heads(block):                             # (M, hd-sliced from D) -> (BH, S, hd)
        heads = [block[:, h * hd:(h + 1) * hd].reshape(1, TB, S, hd) for h in range(n_head)]
        return jnp.concatenate(heads, axis=0).reshape(BH, S, hd)

    # TODO(synk): if N_LAYERS grows beyond ~4, switch this unroll to lax.fori_loop with
    # dynamic indexing of the stacked per-layer weight refs.
    for layer in range(n_layers):
        # ---- multi-head self-attention (weights shared across layers, per the module) ----
        qkv = jnp.dot(x.astype(jnp.bfloat16), wqkv,
                      preferred_element_type=jnp.float32) + bqkv          # (M, 3D) f32

        q = split_heads(qkv[:, :D]).astype(jnp.bfloat16)                  # (BH, S, hd)
        k = split_heads(qkv[:, D:2 * D]).astype(jnp.bfloat16)
        v = split_heads(qkv[:, 2 * D:]).astype(jnp.bfloat16)

        # one batched score einsum + ONE softmax body per layer (f32)
        sc = jnp.einsum('bqd,bkd->bqk', q, k,
                        preferred_element_type=jnp.float32)               # (BH, S, S)
        sc = sc + mask_full
        sc = sc - jnp.max(sc, axis=-1, keepdims=True)
        p = jnp.exp(sc)
        p = p * pl.reciprocal(jnp.sum(p, axis=-1, keepdims=True), approx=True)

        oh = jnp.einsum('bqk,bkd->bqd', p.astype(jnp.bfloat16), v,
                        preferred_element_type=jnp.float32)               # (BH, S, hd)

        # re-assemble heads along lanes and do ONE K=128 output projection
        attn = jnp.concatenate(
            [oh[h * TB:(h + 1) * TB].reshape(M, hd) for h in range(n_head)], axis=-1)
        attn = jnp.dot(attn.astype(jnp.bfloat16), wo,
                       preferred_element_type=jnp.float32) + bo           # (M, D)

        # ---- residual + norm1 ----
        h1 = _layer_norm(x + attn, g1_ref[layer], be1_ref[layer])

        # ---- feed-forward (gelu); dropout = identity in eval ----
        ff = _gelu(jnp.dot(h1.astype(jnp.bfloat16), w1_ref[layer],
                           preferred_element_type=jnp.float32) + b1_ref[layer])
        ff = jnp.dot(ff.astype(jnp.bfloat16), w2_ref[layer],
                     preferred_element_type=jnp.float32) + b2_ref[layer]

        # ---- residual + norm2 ----
        x = _layer_norm(h1 + ff, g2_ref[layer], be2_ref[layer])

    # ---- output head: norm(gelu(linear(x))) -> linear2 (padded to 128 lanes) ----
    h = _gelu(jnp.dot(x.astype(jnp.bfloat16), ow1_ref[...],
                      preferred_element_type=jnp.float32))                # (M, E), no bias
    h = _layer_norm(h, og_ref[...], ob_ref[...])
    out = jnp.dot(h.astype(jnp.bfloat16), ow2_ref[...],
                  preferred_element_type=jnp.float32) + ob2_ref[...]      # (M, 128)
    out_ref[...] = out.reshape(TB, S, OUT_PAD)


# ---------------- pallas_call wrapper ------------------------------------------------------
def run_fused_transformer(x_bsd, mask_b1s, params, *, batch_tile=1):
    B, S, D = x_bsd.shape
    TB = batch_tile
    assert B % TB == 0
    nb = B // TB

    weight_args = (
        params['wqkv_t'], params['bqkv'], params['wo'], params['bo'],
        params['w1'], params['b1'], params['w2'], params['b2'],
        params['g1'], params['be1'], params['g2'], params['be2'],
        params['ow1'], params['og'], params['ob'], params['ow2_pad'], params['ob2_pad'],
    )

    def resident(arr):
        # full-array block, constant index_map -> DMA'd once, stays VMEM-resident
        return pl.BlockSpec(arr.shape, lambda b: (0,) * arr.ndim)

    in_specs = (
        [pl.BlockSpec((TB, S, D), lambda b: (b, 0, 0)),          # activations: tiled over batch
         pl.BlockSpec((TB, 1, S), lambda b: (b, 0, 0))]          # additive key-padding mask
        + [resident(w) for w in weight_args]
    )
    out_spec = pl.BlockSpec((TB, S, OUT_PAD), lambda b: (b, 0, 0))

    # TODO(synk): at realistic workloads, grow M further (bigger host batch / larger TB) —
    # with M=8 per tile every matmul uses a small fraction of the MXU and the kernel is
    # latency-bound; VMEM budget is <1 MiB so scaling TB is free on all generations.
    return pl.pallas_call(
        functools.partial(fused_transformer_kernel, n_head=N_HEAD, n_layers=N_LAYERS),
        out_shape=jax.ShapeDtypeStruct((B, S, OUT_PAD), jnp.float32),
        grid=(nb,),
        in_specs=in_specs,
        out_specs=out_spec,
        compiler_params=pltpu.CompilerParams(
            dimension_semantics=("parallel",)),                  # engages both TCs on v7x
    )(x_bsd, mask_b1s, *weight_args)


# ---------------- parameter construction (deterministic, synthetic) -----------------------
def _sinusoidal_pe(max_len, d_model):
    pos = np.arange(max_len, dtype=np.float32)[:, None]
    div = np.exp(np.arange(0, d_model, 2, dtype=np.float32) * (-np.log(10000.0) / d_model))
    pe = np.zeros((max_len, d_model), dtype=np.float32)
    pe[:, 0::2] = np.sin(pos * div)
    pe[:, 1::2] = np.cos(pos * div)
    return jnp.asarray(pe)


def init_params(key):
    ks = iter(jax.random.split(key, 64))
    n = lambda shape, s=0.02: (s * jax.random.normal(next(ks), shape)).astype(jnp.float32)

    # TODO(synk): TransformerEmbedding source was not provided; implemented as the standard
    # token-embedding(d_embedding, pad row zeroed) -> Linear(d_embedding, d_model) +
    # sinusoidal positional encoding -> LayerNorm -> dropout(identity). Kept in plain JAX
    # (gather has no clean kernel win at this size).
    emb_table = n((VOCAB_NUM, D_EMBEDDING)).at[PAD_IDX].set(0.0)

    # ---- shared MultiheadAttention params (weights pre-transposed -> (in, out)) ----
    scale = 1.0 / float(np.sqrt(HEAD_DIM))
    wqkv = n((D_MODEL, 3 * D_MODEL))
    wqkv = wqkv.at[:, :D_MODEL].multiply(scale)          # fold 1/sqrt(hd) into Q projection
    bqkv = jnp.zeros((1, 3 * D_MODEL), jnp.float32)
    bqkv = bqkv.at[:, :D_MODEL].multiply(scale)          # keep fold consistent (zero anyway)

    params = {
        'emb_table': emb_table,
        'emb_proj_w_t': n((D_EMBEDDING, D_MODEL)),
        'emb_proj_b': jnp.zeros((D_MODEL,), jnp.float32),
        'emb_ln_g': jnp.ones((D_MODEL,), jnp.float32),
        'emb_ln_b': jnp.zeros((D_MODEL,), jnp.float32),
        'pos_enc': _sinusoidal_pe(MAX_LEN, D_MODEL),
        # shared attention (bf16 matmul weights, f32 biases)
        'wqkv_t': wqkv.astype(jnp.bfloat16),
        'bqkv': bqkv,
        'wo': n((D_MODEL, D_MODEL)).astype(jnp.bfloat16),        # full (D, D) out-projection
        'bo': jnp.zeros((1, D_MODEL), jnp.float32),
        # per-layer FFN / LN params, stacked on a leading layer axis
        'w1': n((N_LAYERS, D_MODEL, DIM_FEEDFORWARD)).astype(jnp.bfloat16),
        'b1': jnp.zeros((N_LAYERS, 1, DIM_FEEDFORWARD), jnp.float32),
        'w2': n((N_LAYERS, DIM_FEEDFORWARD, D_MODEL)).astype(jnp.bfloat16),
        'b2': jnp.zeros((N_LAYERS, 1, D_MODEL), jnp.float32),
        'g1': jnp.ones((N_LAYERS, 1, D_MODEL), jnp.float32),
        'be1': jnp.zeros((N_LAYERS, 1, D_MODEL), jnp.float32),
        'g2': jnp.ones((N_LAYERS, 1, D_MODEL), jnp.float32),
        'be2': jnp.zeros((N_LAYERS, 1, D_MODEL), jnp.float32),
        # output head: Linear(d_model, d_emb, bias=False) -> LN -> Linear(d_emb, 3)
        'ow1': n((D_MODEL, D_EMBEDDING)).astype(jnp.bfloat16),
        'og': jnp.ones((1, D_EMBEDDING), jnp.float32),
        'ob': jnp.zeros((1, D_EMBEDDING), jnp.float32),
    }
    # pad the 3-wide head to 128 output lanes (lane-dense stores); wrapper slices [..., :3]
    ow2 = n((D_EMBEDDING, 3))
    params['ow2_pad'] = (jnp.zeros((D_EMBEDDING, OUT_PAD), jnp.float32)
                         .at[:, :3].set(ow2).astype(jnp.bfloat16))
    params['ob2_pad'] = jnp.zeros((1, OUT_PAD), jnp.float32)
    return params


# ---------------- full forward pass --------------------------------------------------------
def transformer_forward(params, src_input_sentence):
    B, S = src_input_sentence.shape

    # key padding mask -> additive attention mask (0 keep, -1e30 pad), shape (B, 1, S)
    mask_add = jnp.where(src_input_sentence == PAD_IDX,
                         jnp.float32(-1e30), jnp.float32(0.0))[:, None, :]

    # --- embedding (glue: gather + small linear + LN, plain JAX) ---
    tok = params['emb_table'][src_input_sentence]                     # (B, S, E)
    x = tok @ params['emb_proj_w_t'] + params['emb_proj_b']           # (B, S, D)
    x = x + params['pos_enc'][:S][None, :, :]
    mu = jnp.mean(x, axis=-1, keepdims=True)
    var = jnp.mean(jnp.square(x - mu), axis=-1, keepdims=True)
    x = (x - mu) * jax.lax.rsqrt(var + LN_EPS) * params['emb_ln_g'] + params['emb_ln_b']
    x = x.astype(jnp.float32)

    # --- fused encoder stack + output head (single Pallas call, batch-parallel grid) ---
    out_pad = run_fused_transformer(x, mask_add, params, batch_tile=1)   # (B, S, 128)
    return out_pad[:, :, :3]                                             # matches final transpose(0,1)


# ---------------- main ----------------------------------------------------------------------
if __name__ == "__main__":
    key = jax.random.PRNGKey(0)
    pkey, dkey = jax.random.split(key)

    params = init_params(pkey)

    batch, seq = 2, 8
    src = jax.random.randint(dkey, (batch, seq), minval=3, maxval=VOCAB_NUM, dtype=jnp.int32)
    src = src.at[1, 6:].set(PAD_IDX)  # exercise the key-padding mask

    fwd = jax.jit(transformer_forward)
    out = fwd(params, src)
    jax.block_until_ready(out)

    assert out.shape == (batch, seq, 3), out.shape
    assert bool(jnp.all(jnp.isfinite(out)))
    print("KERNEL_OK")
</pallas_src>

<mosaic_0001>
module attributes {stable_mosaic.version = 11 : i64} {
  func.func @fused_transformer_kernel(%arg0: i32, %arg1: memref<1x8x128xf32, #tpu.memory_space<vmem>>, %arg2: memref<1x1x8xf32, #tpu.memory_space<vmem>>, %arg3: memref<128x384xbf16, #tpu.memory_space<vmem>>, %arg4: memref<1x384xf32, #tpu.memory_space<vmem>>, %arg5: memref<128x128xbf16, #tpu.memory_space<vmem>>, %arg6: memref<1x128xf32, #tpu.memory_space<vmem>>, %arg7: memref<2x128x256xbf16, #tpu.memory_space<vmem>>, %arg8: memref<2x1x256xf32, #tpu.memory_space<vmem>>, %arg9: memref<2x256x128xbf16, #tpu.memory_space<vmem>>, %arg10: memref<2x1x128xf32, #tpu.memory_space<vmem>>, %arg11: memref<2x1x128xf32, #tpu.memory_space<vmem>>, %arg12: memref<2x1x128xf32, #tpu.memory_space<vmem>>, %arg13: memref<2x1x128xf32, #tpu.memory_space<vmem>>, %arg14: memref<2x1x128xf32, #tpu.memory_space<vmem>>, %arg15: memref<128x64xbf16, #tpu.memory_space<vmem>>, %arg16: memref<1x64xf32, #tpu.memory_space<vmem>>, %arg17: memref<1x64xf32, #tpu.memory_space<vmem>>, %arg18: memref<64x128xbf16, #tpu.memory_space<vmem>>, %arg19: memref<1x128xf32, #tpu.memory_space<vmem>>, %arg20: memref<1x8x128xf32, #tpu.memory_space<vmem>>) attributes {dimension_semantics = [#tpu.dimension_semantics<parallel>], iteration_bounds = array<i64: 2>, scalar_prefetch = 0 : i64, scratch_operands = 0 : i64, tpu.core_type = #tpu.core_type<tc>, window_params = [{transform_indices = @transform_0, window_bounds = array<i64: 1, 8, 128>}, {transform_indices = @transform_1, window_bounds = array<i64: 1, 1, 8>}, {pipeline_mode = #tpu.pipeline_mode<synchronous>, transform_indices = @transform_2, window_bounds = array<i64: 128, 384>}, {pipeline_mode = #tpu.pipeline_mode<synchronous>, transform_indices = @transform_3, window_bounds = array<i64: 1, 384>}, {pipeline_mode = #tpu.pipeline_mode<synchronous>, transform_indices = @transform_4, window_bounds = array<i64: 128, 128>}, {pipeline_mode = #tpu.pipeline_mode<synchronous>, transform_indices = @transform_5, window_bounds = array<i64: 1, 128>}, {pipeline_mode = #tpu.pipeline_mode<synchronous>, transform_indices = @transform_6, window_bounds = array<i64: 2, 128, 256>}, {pipeline_mode = #tpu.pipeline_mode<synchronous>, transform_indices = @transform_7, window_bounds = array<i64: 2, 1, 256>}, {pipeline_mode = #tpu.pipeline_mode<synchronous>, transform_indices = @transform_8, window_bounds = array<i64: 2, 256, 128>}, {pipeline_mode = #tpu.pipeline_mode<synchronous>, transform_indices = @transform_9, window_bounds = array<i64: 2, 1, 128>}, {pipeline_mode = #tpu.pipeline_mode<synchronous>, transform_indices = @transform_10, window_bounds = array<i64: 2, 1, 128>}, {pipeline_mode = #tpu.pipeline_mode<synchronous>, transform_indices = @transform_11, window_bounds = array<i64: 2, 1, 128>}, {pipeline_mode = #tpu.pipeline_mode<synchronous>, transform_indices = @transform_12, window_bounds = array<i64: 2, 1, 128>}, {pipeline_mode = #tpu.pipeline_mode<synchronous>, transform_indices = @transform_13, window_bounds = array<i64: 2, 1, 128>}, {pipeline_mode = #tpu.pipeline_mode<synchronous>, transform_indices = @transform_14, window_bounds = array<i64: 128, 64>}, {pipeline_mode = #tpu.pipeline_mode<synchronous>, transform_indices = @transform_15, window_bounds = array<i64: 1, 64>}, {pipeline_mode = #tpu.pipeline_mode<synchronous>, transform_indices = @transform_16, window_bounds = array<i64: 1, 64>}, {pipeline_mode = #tpu.pipeline_mode<synchronous>, transform_indices = @transform_17, window_bounds = array<i64: 64, 128>}, {pipeline_mode = #tpu.pipeline_mode<synchronous>, transform_indices = @transform_18, window_bounds = array<i64: 1, 128>}, {transform_indices = @transform_19, window_bounds = array<i64: 1, 8, 128>}]} {
    %c0 = arith.constant 0 : index
    %c0_0 = arith.constant 0 : index
    %c0_1 = arith.constant 0 : index
    %0 = vector.load %arg1[%c0, %c0_0, %c0_1] : memref<1x8x128xf32, #tpu.memory_space<vmem>>, vector<1x8x128xf32>
    %1 = vector.shape_cast %0 : vector<1x8x128xf32> to vector<8x128xf32>
    %c0_2 = arith.constant 0 : index
    %c0_3 = arith.constant 0 : index
    %c0_4 = arith.constant 0 : index
    %2 = vector.load %arg2[%c0_2, %c0_3, %c0_4] : memref<1x1x8xf32, #tpu.memory_space<vmem>>, vector<1x1x8xf32>
    %3 = vector.shape_cast %2 : vector<1x1x8xf32> to vector<1x1x1x8xf32>
    %4 = vector.shape_cast %3 : vector<1x1x1x8xf32> to vector<1x1x1x8xf32>
    %5 = vector.broadcast %4 : vector<1x1x1x8xf32> to vector<4x1x8x8xf32>
    %6 = vector.shape_cast %5 : vector<4x1x8x8xf32> to vector<4x8x8xf32>
    %c0_5 = arith.constant 0 : index
    %c0_6 = arith.constant 0 : index
    %7 = vector.load %arg3[%c0_5, %c0_6] : memref<128x384xbf16, #tpu.memory_space<vmem>>, vector<128x384xbf16>
    %c0_7 = arith.constant 0 : index
    %c0_8 = arith.constant 0 : index
    %8 = vector.load %arg4[%c0_7, %c0_8] : memref<1x384xf32, #tpu.memory_space<vmem>>, vector<1x384xf32>
    %c0_9 = arith.constant 0 : index
    %c0_10 = arith.constant 0 : index
    %9 = vector.load %arg5[%c0_9, %c0_10] : memref<128x128xbf16, #tpu.memory_space<vmem>>, vector<128x128xbf16>
    %c0_11 = arith.constant 0 : index
    %c0_12 = arith.constant 0 : index
    %10 = vector.load %arg6[%c0_11, %c0_12] : memref<1x128xf32, #tpu.memory_space<vmem>>, vector<1x128xf32>
    %11 = arith.truncf %1 : vector<8x128xf32> to vector<8x128xbf16>
    %cst = arith.constant dense<0.000000e+00> : vector<8x384xf32>
    %12 = tpu.matmul %11, %7, %cst {dimension_numbers = #tpu.dot_dimension_numbers<[1], [0], [0], [1], [0, 0, 1, 1], [], []>} : vector<8x128xbf16>, vector<128x384xbf16>, vector<8x384xf32> -> vector<8x384xf32>
    %13 = vector.broadcast %8 : vector<1x384xf32> to vector<8x384xf32>
    %14 = arith.addf %12, %13 : vector<8x384xf32>
    %15 = vector.extract_strided_slice %14 {offsets = [0, 0], sizes = [8, 128], strides = [1, 1]} : vector<8x384xf32> to vector<8x128xf32>
    %16 = vector.extract_strided_slice %15 {offsets = [0, 0], sizes = [8, 32], strides = [1, 1]} : vector<8x128xf32> to vector<8x32xf32>
    %17 = vector.shape_cast %16 : vector<8x32xf32> to vector<1x1x8x32xf32>
    %18 = vector.extract_strided_slice %15 {offsets = [0, 32], sizes = [8, 32], strides = [1, 1]} : vector<8x128xf32> to vector<8x32xf32>
    %19 = vector.shape_cast %18 : vector<8x32xf32> to vector<1x1x8x32xf32>
    %20 = vector.extract_strided_slice %15 {offsets = [0, 64], sizes = [8, 32], strides = [1, 1]} : vector<8x128xf32> to vector<8x32xf32>
    %21 = vector.shape_cast %20 : vector<8x32xf32> to vector<1x1x8x32xf32>
    %22 = vector.extract_strided_slice %15 {offsets = [0, 96], sizes = [8, 32], strides = [1, 1]} : vector<8x128xf32> to vector<8x32xf32>
    %23 = vector.shape_cast %22 : vector<8x32xf32> to vector<1x1x8x32xf32>
    %24 = tpu.concatenate %17, %19, %21, %23 in 0 : vector<1x1x8x32xf32>, vector<1x1x8x32xf32>, vector<1x1x8x32xf32>, vector<1x1x8x32xf32> -> vector<4x1x8x32xf32>
    %25 = vector.shape_cast %24 : vector<4x1x8x32xf32> to vector<4x8x32xf32>
    %26 = arith.truncf %25 : vector<4x8x32xf32> to vector<4x8x32xbf16>
    %27 = vector.extract_strided_slice %14 {offsets = [0, 128], sizes = [8, 128], strides = [1, 1]} : vector<8x384xf32> to vector<8x128xf32>
    %28 = vector.extract_strided_slice %27 {offsets = [0, 0], sizes = [8, 32], strides = [1, 1]} : vector<8x128xf32> to vector<8x32xf32>
    %29 = vector.shape_cast %28 : vector<8x32xf32> to vector<1x1x8x32xf32>
    %30 = vector.extract_strided_slice %27 {offsets = [0, 32], sizes = [8, 32], strides = [1, 1]} : vector<8x128xf32> to vector<8x32xf32>
    %31 = vector.shape_cast %30 : vector<8x32xf32> to vector<1x1x8x32xf32>
    %32 = vector.extract_strided_slice %27 {offsets = [0, 64], sizes = [8, 32], strides = [1, 1]} : vector<8x128xf32> to vector<8x32xf32>
    %33 = vector.shape_cast %32 : vector<8x32xf32> to vector<1x1x8x32xf32>
    %34 = vector.extract_strided_slice %27 {offsets = [0, 96], sizes = [8, 32], strides = [1, 1]} : vector<8x128xf32> to vector<8x32xf32>
    %35 = vector.shape_cast %34 : vector<8x32xf32> to vector<1x1x8x32xf32>
    %36 = tpu.concatenate %29, %31, %33, %35 in 0 : vector<1x1x8x32xf32>, vector<1x1x8x32xf32>, vector<1x1x8x32xf32>, vector<1x1x8x32xf32> -> vector<4x1x8x32xf32>
    %37 = vector.shape_cast %36 : vector<4x1x8x32xf32> to vector<4x8x32xf32>
    %38 = arith.truncf %37 : vector<4x8x32xf32> to vector<4x8x32xbf16>
    %39 = vector.extract_strided_slice %14 {offsets = [0, 256], sizes = [8, 128], strides = [1, 1]} : vector<8x384xf32> to vector<8x128xf32>
    %40 = vector.extract_strided_slice %39 {offsets = [0, 0], sizes = [8, 32], strides = [1, 1]} : vector<8x128xf32> to vector<8x32xf32>
    %41 = vector.shape_cast %40 : vector<8x32xf32> to vector<1x1x8x32xf32>
    %42 = vector.extract_strided_slice %39 {offsets = [0, 32], sizes = [8, 32], strides = [1, 1]} : vector<8x128xf32> to vector<8x32xf32>
    %43 = vector.shape_cast %42 : vector<8x32xf32> to vector<1x1x8x32xf32>
    %44 = vector.extract_strided_slice %39 {offsets = [0, 64], sizes = [8, 32], strides = [1, 1]} : vector<8x128xf32> to vector<8x32xf32>
    %45 = vector.shape_cast %44 : vector<8x32xf32> to vector<1x1x8x32xf32>
    %46 = vector.extract_strided_slice %39 {offsets = [0, 96], sizes = [8, 32], strides = [1, 1]} : vector<8x128xf32> to vector<8x32xf32>
    %47 = vector.shape_cast %46 : vector<8x32xf32> to vector<1x1x8x32xf32>
    %48 = tpu.concatenate %41, %43, %45, %47 in 0 : vector<1x1x8x32xf32>, vector<1x1x8x32xf32>, vector<1x1x8x32xf32>, vector<1x1x8x32xf32> -> vector<4x1x8x32xf32>
    %49 = vector.shape_cast %48 : vector<4x1x8x32xf32> to vector<4x8x32xf32>
    %50 = arith.truncf %49 : vector<4x8x32xf32> to vector<4x8x32xbf16>
    "tpu.trace_start"() <{level = 10 : i32, message = "bqd,bkd->bqk"}> : () -> ()
    %cst_13 = arith.constant dense<0.000000e+00> : vector<4x8x8xf32>
    %51 = tpu.matmul %26, %38, %cst_13 {dimension_numbers = #tpu.dot_dimension_numbers<[2], [2], [1], [1], [0, 0, 0, 1, 1, 1], [0], [0]>} : vector<4x8x32xbf16>, vector<4x8x32xbf16>, vector<4x8x8xf32> -> vector<4x8x8xf32>
    "tpu.trace_stop"() : () -> ()
    %52 = arith.addf %51, %6 : vector<4x8x8xf32>
    %cst_14 = arith.constant dense<0xFF800000> : vector<4x8xf32>
    %53 = vector.multi_reduction <maximumf>, %52, %cst_14 [2] : vector<4x8x8xf32> to vector<4x8xf32>
    %54 = vector.shape_cast %53 : vector<4x8xf32> to vector<4x8x1xf32>
    %55 = vector.broadcast %54 : vector<4x8x1xf32> to vector<4x8x8xf32>
    %56 = arith.subf %52, %55 : vector<4x8x8xf32>
    %57 = math.exp %56 : vector<4x8x8xf32>
    %cst_15 = arith.constant dense<0.000000e+00> : vector<4x8xf32>
    %58 = vector.multi_reduction <add>, %57, %cst_15 [2] : vector<4x8x8xf32> to vector<4x8xf32>
    %59 = vector.shape_cast %58 : vector<4x8xf32> to vector<4x8x1xf32>
    %60 = tpu.reciprocal %59 {approx = true} : vector<4x8x1xf32> -> vector<4x8x1xf32>
    %61 = vector.broadcast %60 : vector<4x8x1xf32> to vector<4x8x8xf32>
    %62 = arith.mulf %57, %61 : vector<4x8x8xf32>
    %63 = arith.truncf %62 : vector<4x8x8xf32> to vector<4x8x8xbf16>
    "tpu.trace_start"() <{level = 10 : i32, message = "bqk,bkd->bqd"}> : () -> ()
    %cst_16 = arith.constant dense<0.000000e+00> : vector<4x8x32xf32>
    %64 = tpu.matmul %63, %50, %cst_16 {dimension_numbers = #tpu.dot_dimension_numbers<[2], [1], [1], [2], [0, 0, 0, 1, 1, 2], [0], [0]>} : vector<4x8x8xbf16>, vector<4x8x32xbf16>, vector<4x8x32xf32> -> vector<4x8x32xf32>
    "tpu.trace_stop"() : () -> ()
    %65 = vector.extract_strided_slice %64 {offsets = [0, 0, 0], sizes = [1, 8, 32], strides = [1, 1, 1]} : vector<4x8x32xf32> to vector<1x8x32xf32>
    %66 = vector.shape_cast %65 : vector<1x8x32xf32> to vector<8x32xf32>
    %67 = vector.extract_strided_slice %64 {offsets = [1, 0, 0], sizes = [1, 8, 32], strides = [1, 1, 1]} : vector<4x8x32xf32> to vector<1x8x32xf32>
    %68 = vector.shape_cast %67 : vector<1x8x32xf32> to vector<8x32xf32>
    %69 = vector.extract_strided_slice %64 {offsets = [2, 0, 0], sizes = [1, 8, 32], strides = [1, 1, 1]} : vector<4x8x32xf32> to vector<1x8x32xf32>
    %70 = vector.shape_cast %69 : vector<1x8x32xf32> to vector<8x32xf32>
    %71 = vector.extract_strided_slice %64 {offsets = [3, 0, 0], sizes = [1, 8, 32], strides = [1, 1, 1]} : vector<4x8x32xf32> to vector<1x8x32xf32>
    %72 = vector.shape_cast %71 : vector<1x8x32xf32> to vector<8x32xf32>
    %73 = tpu.concatenate %66, %68, %70, %72 in 1 : vector<8x32xf32>, vector<8x32xf32>, vector<8x32xf32>, vector<8x32xf32> -> vector<8x128xf32>
    %74 = arith.truncf %73 : vector<8x128xf32> to vector<8x128xbf16>
    %cst_17 = arith.constant dense<0.000000e+00> : vector<8x128xf32>
    %75 = tpu.matmul %74, %9, %cst_17 {dimension_numbers = #tpu.dot_dimension_numbers<[1], [0], [0], [1], [0, 0, 1, 1], [], []>} : vector<8x128xbf16>, vector<128x128xbf16>, vector<8x128xf32> -> vector<8x128xf32>
    %76 = vector.broadcast %10 : vector<1x128xf32> to vector<8x128xf32>
    %77 = arith.addf %75, %76 : vector<8x128xf32>
    %78 = arith.addf %1, %77 : vector<8x128xf32>
    %c0_18 = arith.constant 0 : index
    %c0_19 = arith.constant 0 : index
    %c0_20 = arith.constant 0 : index
    %79 = vector.load %arg11[%c0_18, %c0_19, %c0_20] : memref<2x1x128xf32, #tpu.memory_space<vmem>>, vector<1x1x128xf32>
    %80 = vector.shape_cast %79 : vector<1x1x128xf32> to vector<1x128xf32>
    %c0_21 = arith.constant 0 : index
    %c0_22 = arith.constant 0 : index
    %c0_23 = arith.constant 0 : index
    %81 = vector.load %arg12[%c0_21, %c0_22, %c0_23] : memref<2x1x128xf32, #tpu.memory_space<vmem>>, vector<1x1x128xf32>
    %82 = vector.shape_cast %81 : vector<1x1x128xf32> to vector<1x128xf32>
    %cst_24 = arith.constant dense<0.000000e+00> : vector<8xf32>
    %83 = vector.multi_reduction <add>, %78, %cst_24 [1] : vector<8x128xf32> to vector<8xf32>
    %84 = vector.shape_cast %83 : vector<8xf32> to vector<8x1xf32>
    %cst_25 = arith.constant 1.280000e+02 : f32
    %85 = vector.broadcast %cst_25 : f32 to vector<8x1xf32>
    %86 = arith.divf %84, %85 : vector<8x1xf32>
    %87 = vector.broadcast %86 : vector<8x1xf32> to vector<8x128xf32>
    %88 = arith.subf %78, %87 : vector<8x128xf32>
    %89 = arith.mulf %88, %88 : vector<8x128xf32>
    %cst_26 = arith.constant dense<0.000000e+00> : vector<8xf32>
    %90 = vector.multi_reduction <add>, %89, %cst_26 [1] : vector<8x128xf32> to vector<8xf32>
    %91 = vector.shape_cast %90 : vector<8xf32> to vector<8x1xf32>
    %cst_27 = arith.constant 1.280000e+02 : f32
    %92 = vector.broadcast %cst_27 : f32 to vector<8x1xf32>
    %93 = arith.divf %91, %92 : vector<8x1xf32>
    %94 = vector.broadcast %86 : vector<8x1xf32> to vector<8x128xf32>
    %95 = arith.subf %78, %94 : vector<8x128xf32>
    %cst_28 = arith.constant 9.99999974E-6 : f32
    %96 = vector.broadcast %cst_28 : f32 to vector<8x1xf32>
    %97 = arith.addf %93, %96 : vector<8x1xf32>
    %98 = math.rsqrt %97 : vector<8x1xf32>
    %99 = vector.broadcast %98 : vector<8x1xf32> to vector<8x128xf32>
    %100 = arith.mulf %95, %99 : vector<8x128xf32>
    %101 = vector.broadcast %80 : vector<1x128xf32> to vector<8x128xf32>
    %102 = arith.mulf %100, %101 : vector<8x128xf32>
    %103 = vector.broadcast %82 : vector<1x128xf32> to vector<8x128xf32>
    %104 = arith.addf %102, %103 : vector<8x128xf32>
    %105 = arith.truncf %104 : vector<8x128xf32> to vector<8x128xbf16>
    %c0_29 = arith.constant 0 : index
    %c0_30 = arith.constant 0 : index
    %c0_31 = arith.constant 0 : index
    %106 = vector.load %arg7[%c0_29, %c0_30, %c0_31] : memref<2x128x256xbf16, #tpu.memory_space<vmem>>, vector<1x128x256xbf16>
    %107 = vector.shape_cast %106 : vector<1x128x256xbf16> to vector<128x256xbf16>
    %cst_32 = arith.constant dense<0.000000e+00> : vector<8x256xf32>
    %108 = tpu.matmul %105, %107, %cst_32 {dimension_numbers = #tpu.dot_dimension_numbers<[1], [0], [0], [1], [0, 0, 1, 1], [], []>} : vector<8x128xbf16>, vector<128x256xbf16>, vector<8x256xf32> -> vector<8x256xf32>
    %c0_33 = arith.constant 0 : index
    %c0_34 = arith.constant 0 : index
    %c0_35 = arith.constant 0 : index
    %109 = vector.load %arg8[%c0_33, %c0_34, %c0_35] : memref<2x1x256xf32, #tpu.memory_space<vmem>>, vector<1x1x256xf32>
    %110 = vector.shape_cast %109 : vector<1x1x256xf32> to vector<1x256xf32>
    %111 = vector.broadcast %110 : vector<1x256xf32> to vector<8x256xf32>
    %112 = arith.addf %108, %111 : vector<8x256xf32>
    %cst_36 = arith.constant 5.000000e-01 : f32
    %113 = vector.broadcast %cst_36 : f32 to vector<8x256xf32>
    %114 = arith.mulf %113, %112 : vector<8x256xf32>
    %cst_37 = arith.constant 0.707106769 : f32
    %115 = vector.broadcast %cst_37 : f32 to vector<8x256xf32>
    %116 = arith.mulf %112, %115 : vector<8x256xf32>
    %117 = math.erf %116 : vector<8x256xf32>
    %cst_38 = arith.constant 1.000000e+00 : f32
    %118 = vector.broadcast %cst_38 : f32 to vector<8x256xf32>
    %119 = arith.addf %118, %117 : vector<8x256xf32>
    %120 = arith.mulf %114, %119 : vector<8x256xf32>
    %121 = arith.truncf %120 : vector<8x256xf32> to vector<8x256xbf16>
    %c0_39 = arith.constant 0 : index
    %c0_40 = arith.constant 0 : index
    %c0_41 = arith.constant 0 : index
    %122 = vector.load %arg9[%c0_39, %c0_40, %c0_41] : memref<2x256x128xbf16, #tpu.memory_space<vmem>>, vector<1x256x128xbf16>
    %123 = vector.shape_cast %122 : vector<1x256x128xbf16> to vector<256x128xbf16>
    %cst_42 = arith.constant dense<0.000000e+00> : vector<8x128xf32>
    %124 = tpu.matmul %121, %123, %cst_42 {dimension_numbers = #tpu.dot_dimension_numbers<[1], [0], [0], [1], [0, 0, 1, 1], [], []>} : vector<8x256xbf16>, vector<256x128xbf16>, vector<8x128xf32> -> vector<8x128xf32>
    %c0_43 = arith.constant 0 : index
    %c0_44 = arith.constant 0 : index
    %c0_45 = arith.constant 0 : index
    %125 = vector.load %arg10[%c0_43, %c0_44, %c0_45] : memref<2x1x128xf32, #tpu.memory_space<vmem>>, vector<1x1x128xf32>
    %126 = vector.shape_cast %125 : vector<1x1x128xf32> to vector<1x128xf32>
    %127 = vector.broadcast %126 : vector<1x128xf32> to vector<8x128xf32>
    %128 = arith.addf %124, %127 : vector<8x128xf32>
    %129 = arith.addf %104, %128 : vector<8x128xf32>
    %c0_46 = arith.constant 0 : index
    %c0_47 = arith.constant 0 : index
    %c0_48 = arith.constant 0 : index
    %130 = vector.load %arg13[%c0_46, %c0_47, %c0_48] : memref<2x1x128xf32, #tpu.memory_space<vmem>>, vector<1x1x128xf32>
    %131 = vector.shape_cast %130 : vector<1x1x128xf32> to vector<1x128xf32>
    %c0_49 = arith.constant 0 : index
    %c0_50 = arith.constant 0 : index
    %c0_51 = arith.constant 0 : index
    %132 = vector.load %arg14[%c0_49, %c0_50, %c0_51] : memref<2x1x128xf32, #tpu.memory_space<vmem>>, vector<1x1x128xf32>
    %133 = vector.shape_cast %132 : vector<1x1x128xf32> to vector<1x128xf32>
    %cst_52 = arith.constant dense<0.000000e+00> : vector<8xf32>
    %134 = vector.multi_reduction <add>, %129, %cst_52 [1] : vector<8x128xf32> to vector<8xf32>
    %135 = vector.shape_cast %134 : vector<8xf32> to vector<8x1xf32>
    %cst_53 = arith.constant 1.280000e+02 : f32
    %136 = vector.broadcast %cst_53 : f32 to vector<8x1xf32>
    %137 = arith.divf %135, %136 : vector<8x1xf32>
    %138 = vector.broadcast %137 : vector<8x1xf32> to vector<8x128xf32>
    %139 = arith.subf %129, %138 : vector<8x128xf32>
    %140 = arith.mulf %139, %139 : vector<8x128xf32>
    %cst_54 = arith.constant dense<0.000000e+00> : vector<8xf32>
    %141 = vector.multi_reduction <add>, %140, %cst_54 [1] : vector<8x128xf32> to vector<8xf32>
    %142 = vector.shape_cast %141 : vector<8xf32> to vector<8x1xf32>
    %cst_55 = arith.constant 1.280000e+02 : f32
    %143 = vector.broadcast %cst_55 : f32 to vector<8x1xf32>
    %144 = arith.divf %142, %143 : vector<8x1xf32>
    %145 = vector.broadcast %137 : vector<8x1xf32> to vector<8x128xf32>
    %146 = arith.subf %129, %145 : vector<8x128xf32>
    %cst_56 = arith.constant 9.99999974E-6 : f32
    %147 = vector.broadcast %cst_56 : f32 to vector<8x1xf32>
    %148 = arith.addf %144, %147 : vector<8x1xf32>
    %149 = math.rsqrt %148 : vector<8x1xf32>
    %150 = vector.broadcast %149 : vector<8x1xf32> to vector<8x128xf32>
    %151 = arith.mulf %146, %150 : vector<8x128xf32>
    %152 = vector.broadcast %131 : vector<1x128xf32> to vector<8x128xf32>
    %153 = arith.mulf %151, %152 : vector<8x128xf32>
    %154 = vector.broadcast %133 : vector<1x128xf32> to vector<8x128xf32>
    %155 = arith.addf %153, %154 : vector<8x128xf32>
    %156 = arith.truncf %155 : vector<8x128xf32> to vector<8x128xbf16>
    %cst_57 = arith.constant dense<0.000000e+00> : vector<8x384xf32>
    %157 = tpu.matmul %156, %7, %cst_57 {dimension_numbers = #tpu.dot_dimension_numbers<[1], [0], [0], [1], [0, 0, 1, 1], [], []>} : vector<8x128xbf16>, vector<128x384xbf16>, vector<8x384xf32> -> vector<8x384xf32>
    %158 = vector.broadcast %8 : vector<1x384xf32> to vector<8x384xf32>
    %159 = arith.addf %157, %158 : vector<8x384xf32>
    %160 = vector.extract_strided_slice %159 {offsets = [0, 0], sizes = [8, 128], strides = [1, 1]} : vector<8x384xf32> to vector<8x128xf32>
    %161 = vector.extract_strided_slice %160 {offsets = [0, 0], sizes = [8, 32], strides = [1, 1]} : vector<8x128xf32> to vector<8x32xf32>
    %162 = vector.shape_cast %161 : vector<8x32xf32> to vector<1x1x8x32xf32>
    %163 = vector.extract_strided_slice %160 {offsets = [0, 32], sizes = [8, 32], strides = [1, 1]} : vector<8x128xf32> to vector<8x32xf32>
    %164 = vector.shape_cast %163 : vector<8x32xf32> to vector<1x1x8x32xf32>
    %165 = vector.extract_strided_slice %160 {offsets = [0, 64], sizes = [8, 32], strides = [1, 1]} : vector<8x128xf32> to vector<8x32xf32>
    %166 = vector.shape_cast %165 : vector<8x32xf32> to vector<1x1x8x32xf32>
    %167 = vector.extract_strided_slice %160 {offsets = [0, 96], sizes = [8, 32], strides = [1, 1]} : vector<8x128xf32> to vector<8x32xf32>
    %168 = vector.shape_cast %167 : vector<8x32xf32> to vector<1x1x8x32xf32>
    %169 = tpu.concatenate %162, %164, %166, %168 in 0 : vector<1x1x8x32xf32>, vector<1x1x8x32xf32>, vector<1x1x8x32xf32>, vector<1x1x8x32xf32> -> vector<4x1x8x32xf32>
    %170 = vector.shape_cast %169 : vector<4x1x8x32xf32> to vector<4x8x32xf32>
    %171 = arith.truncf %170 : vector<4x8x32xf32> to vector<4x8x32xbf16>
    %172 = vector.extract_strided_slice %159 {offsets = [0, 128], sizes = [8, 128], strides = [1, 1]} : vector<8x384xf32> to vector<8x128xf32>
    %173 = vector.extract_strided_slice %172 {offsets = [0, 0], sizes = [8, 32], strides = [1, 1]} : vector<8x128xf32> to vector<8x32xf32>
    %174 = vector.shape_cast %173 : vector<8x32xf32> to vector<1x1x8x32xf32>
    %175 = vector.extract_strided_slice %172 {offsets = [0, 32], sizes = [8, 32], strides = [1, 1]} : vector<8x128xf32> to vector<8x32xf32>
    %176 = vector.shape_cast %175 : vector<8x32xf32> to vector<1x1x8x32xf32>
    %177 = vector.extract_strided_slice %172 {offsets = [0, 64], sizes = [8, 32], strides = [1, 1]} : vector<8x128xf32> to vector<8x32xf32>
    %178 = vector.shape_cast %177 : vector<8x32xf32> to vector<1x1x8x32xf32>
    %179 = vector.extract_strided_slice %172 {offsets = [0, 96], sizes = [8, 32], strides = [1, 1]} : vector<8x128xf32> to vector<8x32xf32>
    %180 = vector.shape_cast %179 : vector<8x32xf32> to vector<1x1x8x32xf32>
    %181 = tpu.concatenate %174, %176, %178, %180 in 0 : vector<1x1x8x32xf32>, vector<1x1x8x32xf32>, vector<1x1x8x32xf32>, vector<1x1x8x32xf32> -> vector<4x1x8x32xf32>
    %182 = vector.shape_cast %181 : vector<4x1x8x32xf32> to vector<4x8x32xf32>
    %183 = arith.truncf %182 : vector<4x8x32xf32> to vector<4x8x32xbf16>
    %184 = vector.extract_strided_slice %159 {offsets = [0, 256], sizes = [8, 128], strides = [1, 1]} : vector<8x384xf32> to vector<8x128xf32>
    %185 = vector.extract_strided_slice %184 {offsets = [0, 0], sizes = [8, 32], strides = [1, 1]} : vector<8x128xf32> to vector<8x32xf32>
    %186 = vector.shape_cast %185 : vector<8x32xf32> to vector<1x1x8x32xf32>
    %187 = vector.extract_strided_slice %184 {offsets = [0, 32], sizes = [8, 32], strides = [1, 1]} : vector<8x128xf32> to vector<8x32xf32>
    %188 = vector.shape_cast %187 : vector<8x32xf32> to vector<1x1x8x32xf32>
    %189 = vector.extract_strided_slice %184 {offsets = [0, 64], sizes = [8, 32], strides = [1, 1]} : vector<8x128xf32> to vector<8x32xf32>
    %190 = vector.shape_cast %189 : vector<8x32xf32> to vector<1x1x8x32xf32>
    %191 = vector.extract_strided_slice %184 {offsets = [0, 96], sizes = [8, 32], strides = [1, 1]} : vector<8x128xf32> to vector<8x32xf32>
    %192 = vector.shape_cast %191 : vector<8x32xf32> to vector<1x1x8x32xf32>
    %193 = tpu.concatenate %186, %188, %190, %192 in 0 : vector<1x1x8x32xf32>, vector<1x1x8x32xf32>, vector<1x1x8x32xf32>, vector<1x1x8x32xf32> -> vector<4x1x8x32xf32>
    %194 = vector.shape_cast %193 : vector<4x1x8x32xf32> to vector<4x8x32xf32>
    %195 = arith.truncf %194 : vector<4x8x32xf32> to vector<4x8x32xbf16>
    "tpu.trace_start"() <{level = 10 : i32, message = "bqd,bkd->bqk"}> : () -> ()
    %cst_58 = arith.constant dense<0.000000e+00> : vector<4x8x8xf32>
    %196 = tpu.matmul %171, %183, %cst_58 {dimension_numbers = #tpu.dot_dimension_numbers<[2], [2], [1], [1], [0, 0, 0, 1, 1, 1], [0], [0]>} : vector<4x8x32xbf16>, vector<4x8x32xbf16>, vector<4x8x8xf32> -> vector<4x8x8xf32>
    "tpu.trace_stop"() : () -> ()
    %197 = arith.addf %196, %6 : vector<4x8x8xf32>
    %cst_59 = arith.constant dense<0xFF800000> : vector<4x8xf32>
    %198 = vector.multi_reduction <maximumf>, %197, %cst_59 [2] : vector<4x8x8xf32> to vector<4x8xf32>
    %199 = vector.shape_cast %198 : vector<4x8xf32> to vector<4x8x1xf32>
    %200 = vector.broadcast %199 : vector<4x8x1xf32> to vector<4x8x8xf32>
    %201 = arith.subf %197, %200 : vector<4x8x8xf32>
    %202 = math.exp %201 : vector<4x8x8xf32>
    %cst_60 = arith.constant dense<0.000000e+00> : vector<4x8xf32>
    %203 = vector.multi_reduction <add>, %202, %cst_60 [2] : vector<4x8x8xf32> to vector<4x8xf32>
    %204 = vector.shape_cast %203 : vector<4x8xf32> to vector<4x8x1xf32>
    %205 = tpu.reciprocal %204 {approx = true} : vector<4x8x1xf32> -> vector<4x8x1xf32>
    %206 = vector.broadcast %205 : vector<4x8x1xf32> to vector<4x8x8xf32>
    %207 = arith.mulf %202, %206 : vector<4x8x8xf32>
    %208 = arith.truncf %207 : vector<4x8x8xf32> to vector<4x8x8xbf16>
    "tpu.trace_start"() <{level = 10 : i32, message = "bqk,bkd->bqd"}> : () -> ()
    %cst_61 = arith.constant dense<0.000000e+00> : vector<4x8x32xf32>
    %209 = tpu.matmul %208, %195, %cst_61 {dimension_numbers = #tpu.dot_dimension_numbers<[2], [1], [1], [2], [0, 0, 0, 1, 1, 2], [0], [0]>} : vector<4x8x8xbf16>, vector<4x8x32xbf16>, vector<4x8x32xf32> -> vector<4x8x32xf32>
    "tpu.trace_stop"() : () -> ()
    %210 = vector.extract_strided_slice %209 {offsets = [0, 0, 0], sizes = [1, 8, 32], strides = [1, 1, 1]} : vector<4x8x32xf32> to vector<1x8x32xf32>
    %211 = vector.shape_cast %210 : vector<1x8x32xf32> to vector<8x32xf32>
    %212 = vector.extract_strided_slice %209 {offsets = [1, 0, 0], sizes = [1, 8, 32], strides = [1, 1, 1]} : vector<4x8x32xf32> to vector<1x8x32xf32>
    %213 = vector.shape_cast %212 : vector<1x8x32xf32> to vector<8x32xf32>
    %214 = vector.extract_strided_slice %209 {offsets = [2, 0, 0], sizes = [1, 8, 32], strides = [1, 1, 1]} : vector<4x8x32xf32> to vector<1x8x32xf32>
    %215 = vector.shape_cast %214 : vector<1x8x32xf32> to vector<8x32xf32>
    %216 = vector.extract_strided_slice %209 {offsets = [3, 0, 0], sizes = [1, 8, 32], strides = [1, 1, 1]} : vector<4x8x32xf32> to vector<1x8x32xf32>
    %217 = vector.shape_cast %216 : vector<1x8x32xf32> to vector<8x32xf32>
    %218 = tpu.concatenate %211, %213, %215, %217 in 1 : vector<8x32xf32>, vector<8x32xf32>, vector<8x32xf32>, vector<8x32xf32> -> vector<8x128xf32>
    %219 = arith.truncf %218 : vector<8x128xf32> to vector<8x128xbf16>
    %cst_62 = arith.constant dense<0.000000e+00> : vector<8x128xf32>
    %220 = tpu.matmul %219, %9, %cst_62 {dimension_numbers = #tpu.dot_dimension_numbers<[1], [0], [0], [1], [0, 0, 1, 1], [], []>} : vector<8x128xbf16>, vector<128x128xbf16>, vector<8x128xf32> -> vector<8x128xf32>
    %221 = vector.broadcast %10 : vector<1x128xf32> to vector<8x128xf32>
    %222 = arith.addf %220, %221 : vector<8x128xf32>
    %223 = arith.addf %155, %222 : vector<8x128xf32>
    %c1 = arith.constant 1 : index
    %c0_63 = arith.constant 0 : index
    %c0_64 = arith.constant 0 : index
    %224 = vector.load %arg11[%c1, %c0_63, %c0_64] : memref<2x1x128xf32, #tpu.memory_space<vmem>>, vector<1x1x128xf32>
    %225 = vector.shape_cast %224 : vector<1x1x128xf32> to vector<1x128xf32>
    %c1_65 = arith.constant 1 : index
    %c0_66 = arith.constant 0 : index
    %c0_67 = arith.constant 0 : index
    %226 = vector.load %arg12[%c1_65, %c0_66, %c0_67] : memref<2x1x128xf32, #tpu.memory_space<vmem>>, vector<1x1x128xf32>
    %227 = vector.shape_cast %226 : vector<1x1x128xf32> to vector<1x128xf32>
    %cst_68 = arith.constant dense<0.000000e+00> : vector<8xf32>
    %228 = vector.multi_reduction <add>, %223, %cst_68 [1] : vector<8x128xf32> to vector<8xf32>
    %229 = vector.shape_cast %228 : vector<8xf32> to vector<8x1xf32>
    %cst_69 = arith.constant 1.280000e+02 : f32
    %230 = vector.broadcast %cst_69 : f32 to vector<8x1xf32>
    %231 = arith.divf %229, %230 : vector<8x1xf32>
    %232 = vector.broadcast %231 : vector<8x1xf32> to vector<8x128xf32>
    %233 = arith.subf %223, %232 : vector<8x128xf32>
    %234 = arith.mulf %233, %233 : vector<8x128xf32>
    %cst_70 = arith.constant dense<0.000000e+00> : vector<8xf32>
    %235 = vector.multi_reduction <add>, %234, %cst_70 [1] : vector<8x128xf32> to vector<8xf32>
    %236 = vector.shape_cast %235 : vector<8xf32> to vector<8x1xf32>
    %cst_71 = arith.constant 1.280000e+02 : f32
    %237 = vector.broadcast %cst_71 : f32 to vector<8x1xf32>
    %238 = arith.divf %236, %237 : vector<8x1xf32>
    %239 = vector.broadcast %231 : vector<8x1xf32> to vector<8x128xf32>
    %240 = arith.subf %223, %239 : vector<8x128xf32>
    %cst_72 = arith.constant 9.99999974E-6 : f32
    %241 = vector.broadcast %cst_72 : f32 to vector<8x1xf32>
    %242 = arith.addf %238, %241 : vector<8x1xf32>
    %243 = math.rsqrt %242 : vector<8x1xf32>
    %244 = vector.broadcast %243 : vector<8x1xf32> to vector<8x128xf32>
    %245 = arith.mulf %240, %244 : vector<8x128xf32>
    %246 = vector.broadcast %225 : vector<1x128xf32> to vector<8x128xf32>
    %247 = arith.mulf %245, %246 : vector<8x128xf32>
    %248 = vector.broadcast %227 : vector<1x128xf32> to vector<8x128xf32>
    %249 = arith.addf %247, %248 : vector<8x128xf32>
    %250 = arith.truncf %249 : vector<8x128xf32> to vector<8x128xbf16>
    %c1_73 = arith.constant 1 : index
    %c0_74 = arith.constant 0 : index
    %c0_75 = arith.constant 0 : index
    %251 = vector.load %arg7[%c1_73, %c0_74, %c0_75] : memref<2x128x256xbf16, #tpu.memory_space<vmem>>, vector<1x128x256xbf16>
    %252 = vector.shape_cast %251 : vector<1x128x256xbf16> to vector<128x256xbf16>
    %cst_76 = arith.constant dense<0.000000e+00> : vector<8x256xf32>
    %253 = tpu.matmul %250, %252, %cst_76 {dimension_numbers = #tpu.dot_dimension_numbers<[1], [0], [0], [1], [0, 0, 1, 1], [], []>} : vector<8x128xbf16>, vector<128x256xbf16>, vector<8x256xf32> -> vector<8x256xf32>
    %c1_77 = arith.constant 1 : index
    %c0_78 = arith.constant 0 : index
    %c0_79 = arith.constant 0 : index
    %254 = vector.load %arg8[%c1_77, %c0_78, %c0_79] : memref<2x1x256xf32, #tpu.memory_space<vmem>>, vector<1x1x256xf32>
    %255 = vector.shape_cast %254 : vector<1x1x256xf32> to vector<1x256xf32>
    %256 = vector.broadcast %255 : vector<1x256xf32> to vector<8x256xf32>
    %257 = arith.addf %253, %256 : vector<8x256xf32>
    %cst_80 = arith.constant 5.000000e-01 : f32
    %258 = vector.broadcast %cst_80 : f32 to vector<8x256xf32>
    %259 = arith.mulf %258, %257 : vector<8x256xf32>
    %cst_81 = arith.constant 0.707106769 : f32
    %260 = vector.broadcast %cst_81 : f32 to vector<8x256xf32>
    %261 = arith.mulf %257, %260 : vector<8x256xf32>
    %262 = math.erf %261 : vector<8x256xf32>
    %cst_82 = arith.constant 1.000000e+00 : f32
    %263 = vector.broadcast %cst_82 : f32 to vector<8x256xf32>
    %264 = arith.addf %263, %262 : vector<8x256xf32>
    %265 = arith.mulf %259, %264 : vector<8x256xf32>
    %266 = arith.truncf %265 : vector<8x256xf32> to vector<8x256xbf16>
    %c1_83 = arith.constant 1 : index
    %c0_84 = arith.constant 0 : index
    %c0_85 = arith.constant 0 : index
    %267 = vector.load %arg9[%c1_83, %c0_84, %c0_85] : memref<2x256x128xbf16, #tpu.memory_space<vmem>>, vector<1x256x128xbf16>
    %268 = vector.shape_cast %267 : vector<1x256x128xbf16> to vector<256x128xbf16>
    %cst_86 = arith.constant dense<0.000000e+00> : vector<8x128xf32>
    %269 = tpu.matmul %266, %268, %cst_86 {dimension_numbers = #tpu.dot_dimension_numbers<[1], [0], [0], [1], [0, 0, 1, 1], [], []>} : vector<8x256xbf16>, vector<256x128xbf16>, vector<8x128xf32> -> vector<8x128xf32>
    %c1_87 = arith.constant 1 : index
    %c0_88 = arith.constant 0 : index
    %c0_89 = arith.constant 0 : index
    %270 = vector.load %arg10[%c1_87, %c0_88, %c0_89] : memref<2x1x128xf32, #tpu.memory_space<vmem>>, vector<1x1x128xf32>
    %271 = vector.shape_cast %270 : vector<1x1x128xf32> to vector<1x128xf32>
    %272 = vector.broadcast %271 : vector<1x128xf32> to vector<8x128xf32>
    %273 = arith.addf %269, %272 : vector<8x128xf32>
    %274 = arith.addf %249, %273 : vector<8x128xf32>
    %c1_90 = arith.constant 1 : index
    %c0_91 = arith.constant 0 : index
    %c0_92 = arith.constant 0 : index
    %275 = vector.load %arg13[%c1_90, %c0_91, %c0_92] : memref<2x1x128xf32, #tpu.memory_space<vmem>>, vector<1x1x128xf32>
    %276 = vector.shape_cast %275 : vector<1x1x128xf32> to vector<1x128xf32>
    %c1_93 = arith.constant 1 : index
    %c0_94 = arith.constant 0 : index
    %c0_95 = arith.constant 0 : index
    %277 = vector.load %arg14[%c1_93, %c0_94, %c0_95] : memref<2x1x128xf32, #tpu.memory_space<vmem>>, vector<1x1x128xf32>
    %278 = vector.shape_cast %277 : vector<1x1x128xf32> to vector<1x128xf32>
    %cst_96 = arith.constant dense<0.000000e+00> : vector<8xf32>
    %279 = vector.multi_reduction <add>, %274, %cst_96 [1] : vector<8x128xf32> to vector<8xf32>
    %280 = vector.shape_cast %279 : vector<8xf32> to vector<8x1xf32>
    %cst_97 = arith.constant 1.280000e+02 : f32
    %281 = vector.broadcast %cst_97 : f32 to vector<8x1xf32>
    %282 = arith.divf %280, %281 : vector<8x1xf32>
    %283 = vector.broadcast %282 : vector<8x1xf32> to vector<8x128xf32>
    %284 = arith.subf %274, %283 : vector<8x128xf32>
    %285 = arith.mulf %284, %284 : vector<8x128xf32>
    %cst_98 = arith.constant dense<0.000000e+00> : vector<8xf32>
    %286 = vector.multi_reduction <add>, %285, %cst_98 [1] : vector<8x128xf32> to vector<8xf32>
    %287 = vector.shape_cast %286 : vector<8xf32> to vector<8x1xf32>
    %cst_99 = arith.constant 1.280000e+02 : f32
    %288 = vector.broadcast %cst_99 : f32 to vector<8x1xf32>
    %289 = arith.divf %287, %288 : vector<8x1xf32>
    %290 = vector.broadcast %282 : vector<8x1xf32> to vector<8x128xf32>
    %291 = arith.subf %274, %290 : vector<8x128xf32>
    %cst_100 = arith.constant 9.99999974E-6 : f32
    %292 = vector.broadcast %cst_100 : f32 to vector<8x1xf32>
    %293 = arith.addf %289, %292 : vector<8x1xf32>
    %294 = math.rsqrt %293 : vector<8x1xf32>
    %295 = vector.broadcast %294 : vector<8x1xf32> to vector<8x128xf32>
    %296 = arith.mulf %291, %295 : vector<8x128xf32>
    %297 = vector.broadcast %276 : vector<1x128xf32> to vector<8x128xf32>
    %298 = arith.mulf %296, %297 : vector<8x128xf32>
    %299 = vector.broadcast %278 : vector<1x128xf32> to vector<8x128xf32>
    %300 = arith.addf %298, %299 : vector<8x128xf32>
    %301 = arith.truncf %300 : vector<8x128xf32> to vector<8x128xbf16>
    %c0_101 = arith.constant 0 : index
    %c0_102 = arith.constant 0 : index
    %302 = vector.load %arg15[%c0_101, %c0_102] : memref<128x64xbf16, #tpu.memory_space<vmem>>, vector<128x64xbf16>
    %cst_103 = arith.constant dense<0.000000e+00> : vector<8x64xf32>
    %303 = tpu.matmul %301, %302, %cst_103 {dimension_numbers = #tpu.dot_dimension_numbers<[1], [0], [0], [1], [0, 0, 1, 1], [], []>} : vector<8x128xbf16>, vector<128x64xbf16>, vector<8x64xf32> -> vector<8x64xf32>
    %cst_104 = arith.constant 5.000000e-01 : f32
    %304 = vector.broadcast %cst_104 : f32 to vector<8x64xf32>
    %305 = arith.mulf %304, %303 : vector<8x64xf32>
    %cst_105 = arith.constant 0.707106769 : f32
    %306 = vector.broadcast %cst_105 : f32 to vector<8x64xf32>
    %307 = arith.mulf %303, %306 : vector<8x64xf32>
    %308 = math.erf %307 : vector<8x64xf32>
    %cst_106 = arith.constant 1.000000e+00 : f32
    %309 = vector.broadcast %cst_106 : f32 to vector<8x64xf32>
    %310 = arith.addf %309, %308 : vector<8x64xf32>
    %311 = arith.mulf %305, %310 : vector<8x64xf32>
    %c0_107 = arith.constant 0 : index
    %c0_108 = arith.constant 0 : index
    %312 = vector.load %arg16[%c0_107, %c0_108] : memref<1x64xf32, #tpu.memory_space<vmem>>, vector<1x64xf32>
    %c0_109 = arith.constant 0 : index
    %c0_110 = arith.constant 0 : index
    %313 = vector.load %arg17[%c0_109, %c0_110] : memref<1x64xf32, #tpu.memory_space<vmem>>, vector<1x64xf32>
    %cst_111 = arith.constant dense<0.000000e+00> : vector<8xf32>
    %314 = vector.multi_reduction <add>, %311, %cst_111 [1] : vector<8x64xf32> to vector<8xf32>
    %315 = vector.shape_cast %314 : vector<8xf32> to vector<8x1xf32>
    %cst_112 = arith.constant 6.400000e+01 : f32
    %316 = vector.broadcast %cst_112 : f32 to vector<8x1xf32>
    %317 = arith.divf %315, %316 : vector<8x1xf32>
    %318 = vector.broadcast %317 : vector<8x1xf32> to vector<8x64xf32>
    %319 = arith.subf %311, %318 : vector<8x64xf32>
    %320 = arith.mulf %319, %319 : vector<8x64xf32>
    %cst_113 = arith.constant dense<0.000000e+00> : vector<8xf32>
    %321 = vector.multi_reduction <add>, %320, %cst_113 [1] : vector<8x64xf32> to vector<8xf32>
    %322 = vector.shape_cast %321 : vector<8xf32> to vector<8x1xf32>
    %cst_114 = arith.constant 6.400000e+01 : f32
    %323 = vector.broadcast %cst_114 : f32 to vector<8x1xf32>
    %324 = arith.divf %322, %323 : vector<8x1xf32>
    %325 = vector.broadcast %317 : vector<8x1xf32> to vector<8x64xf32>
    %326 = arith.subf %311, %325 : vector<8x64xf32>
    %cst_115 = arith.constant 9.99999974E-6 : f32
    %327 = vector.broadcast %cst_115 : f32 to vector<8x1xf32>
    %328 = arith.addf %324, %327 : vector<8x1xf32>
    %329 = math.rsqrt %328 : vector<8x1xf32>
    %330 = vector.broadcast %329 : vector<8x1xf32> to vector<8x64xf32>
    %331 = arith.mulf %326, %330 : vector<8x64xf32>
    %332 = vector.broadcast %312 : vector<1x64xf32> to vector<8x64xf32>
    %333 = arith.mulf %331, %332 : vector<8x64xf32>
    %334 = vector.broadcast %313 : vector<1x64xf32> to vector<8x64xf32>
    %335 = arith.addf %333, %334 : vector<8x64xf32>
    %336 = arith.truncf %335 : vector<8x64xf32> to vector<8x64xbf16>
    %c0_116 = arith.constant 0 : index
    %c0_117 = arith.constant 0 : index
    %337 = vector.load %arg18[%c0_116, %c0_117] : memref<64x128xbf16, #tpu.memory_space<vmem>>, vector<64x128xbf16>
    %cst_118 = arith.constant dense<0.000000e+00> : vector<8x128xf32>
    %338 = tpu.matmul %336, %337, %cst_118 {dimension_numbers = #tpu.dot_dimension_numbers<[1], [0], [0], [1], [0, 0, 1, 1], [], []>} : vector<8x64xbf16>, vector<64x128xbf16>, vector<8x128xf32> -> vector<8x128xf32>
    %c0_119 = arith.constant 0 : index
    %c0_120 = arith.constant 0 : index
    %339 = vector.load %arg19[%c0_119, %c0_120] : memref<1x128xf32, #tpu.memory_space<vmem>>, vector<1x128xf32>
    %340 = vector.broadcast %339 : vector<1x128xf32> to vector<8x128xf32>
    %341 = arith.addf %338, %340 : vector<8x128xf32>
    %342 = vector.shape_cast %341 : vector<8x128xf32> to vector<1x8x128xf32>
    %c0_121 = arith.constant 0 : index
    %c0_122 = arith.constant 0 : index
    %c0_123 = arith.constant 0 : index
    %343 = vector.load %arg20[%c0_121, %c0_122, %c0_123] : memref<1x8x128xf32, #tpu.memory_space<vmem>>, vector<1x8x128xf32>
    tpu.vector_store %arg20[%c0_121, %c0_122, %c0_123], %342 {strides = array<i32>} : memref<1x8x128xf32, #tpu.memory_space<vmem>>, vector<1x8x128xf32>,
    return
  }
  func.func @transform_0(%arg0: i32) -> (i32, i32, i32) {
    %c0_i32 = arith.constant 0 : i32
    %c0_i32_0 = arith.constant 0 : i32
    %c0_i32_1 = arith.constant 0 : i32
    return %arg0, %c0_i32, %c0_i32_0 : i32, i32, i32
  }
  func.func @transform_1(%arg0: i32) -> (i32, i32, i32) {
    %c0_i32 = arith.constant 0 : i32
    %c0_i32_0 = arith.constant 0 : i32
    %c0_i32_1 = arith.constant 0 : i32
    return %arg0, %c0_i32, %c0_i32_0 : i32, i32, i32
  }
  func.func @transform_2(%arg0: i32) -> (i32, i32) {
    %c0_i32 = arith.constant 0 : i32
    %c0_i32_0 = arith.constant 0 : i32
    %c0_i32_1 = arith.constant 0 : i32
    return %c0_i32, %c0_i32_0 : i32, i32
  }
  func.func @transform_3(%arg0: i32) -> (i32, i32) {
    %c0_i32 = arith.constant 0 : i32
    %c0_i32_0 = arith.constant 0 : i32
    %c0_i32_1 = arith.constant 0 : i32
    return %c0_i32, %c0_i32_0 : i32, i32
  }
  func.func @transform_4(%arg0: i32) -> (i32, i32) {
    %c0_i32 = arith.constant 0 : i32
    %c0_i32_0 = arith.constant 0 : i32
    %c0_i32_1 = arith.constant 0 : i32
    return %c0_i32, %c0_i32_0 : i32, i32
  }
  func.func @transform_5(%arg0: i32) -> (i32, i32) {
    %c0_i32 = arith.constant 0 : i32
    %c0_i32_0 = arith.constant 0 : i32
    %c0_i32_1 = arith.constant 0 : i32
    return %c0_i32, %c0_i32_0 : i32, i32
  }
  func.func @transform_6(%arg0: i32) -> (i32, i32, i32) {
    %c0_i32 = arith.constant 0 : i32
    %c0_i32_0 = arith.constant 0 : i32
    %c0_i32_1 = arith.constant 0 : i32
    %c0_i32_2 = arith.constant 0 : i32
    return %c0_i32, %c0_i32_0, %c0_i32_1 : i32, i32, i32
  }
  func.func @transform_7(%arg0: i32) -> (i32, i32, i32) {
    %c0_i32 = arith.constant 0 : i32
    %c0_i32_0 = arith.constant 0 : i32
    %c0_i32_1 = arith.constant 0 : i32
    %c0_i32_2 = arith.constant 0 : i32
    return %c0_i32, %c0_i32_0, %c0_i32_1 : i32, i32, i32
  }
  func.func @transform_8(%arg0: i32) -> (i32, i32, i32) {
    %c0_i32 = arith.constant 0 : i32
    %c0_i32_0 = arith.constant 0 : i32
    %c0_i32_1 = arith.constant 0 : i32
    %c0_i32_2 = arith.constant 0 : i32
    return %c0_i32, %c0_i32_0, %c0_i32_1 : i32, i32, i32
  }
  func.func @transform_9(%arg0: i32) -> (i32, i32, i32) {
    %c0_i32 = arith.constant 0 : i32
    %c0_i32_0 = arith.constant 0 : i32
    %c0_i32_1 = arith.constant 0 : i32
    %c0_i32_2 = arith.constant 0 : i32
    return %c0_i32, %c0_i32_0, %c0_i32_1 : i32, i32, i32
  }
  func.func @transform_10(%arg0: i32) -> (i32, i32, i32) {
    %c0_i32 = arith.constant 0 : i32
    %c0_i32_0 = arith.constant 0 : i32
    %c0_i32_1 = arith.constant 0 : i32
    %c0_i32_2 = arith.constant 0 : i32
    return %c0_i32, %c0_i32_0, %c0_i32_1 : i32, i32, i32
  }
  func.func @transform_11(%arg0: i32) -> (i32, i32, i32) {
    %c0_i32 = arith.constant 0 : i32
    %c0_i32_0 = arith.constant 0 : i32
    %c0_i32_1 = arith.constant 0 : i32
    %c0_i32_2 = arith.constant 0 : i32
    return %c0_i32, %c0_i32_0, %c0_i32_1 : i32, i32, i32
  }
  func.func @transform_12(%arg0: i32) -> (i32, i32, i32) {
    %c0_i32 = arith.constant 0 : i32
    %c0_i32_0 = arith.constant 0 : i32
    %c0_i32_1 = arith.constant 0 : i32
    %c0_i32_2 = arith.constant 0 : i32
    return %c0_i32, %c0_i32_0, %c0_i32_1 : i32, i32, i32
  }
  func.func @transform_13(%arg0: i32) -> (i32, i32, i32) {
    %c0_i32 = arith.constant 0 : i32
    %c0_i32_0 = arith.constant 0 : i32
    %c0_i32_1 = arith.constant 0 : i32
    %c0_i32_2 = arith.constant 0 : i32
    return %c0_i32, %c0_i32_0, %c0_i32_1 : i32, i32, i32
  }
  func.func @transform_14(%arg0: i32) -> (i32, i32) {
    %c0_i32 = arith.constant 0 : i32
    %c0_i32_0 = arith.constant 0 : i32
    %c0_i32_1 = arith.constant 0 : i32
    return %c0_i32, %c0_i32_0 : i32, i32
  }
  func.func @transform_15(%arg0: i32) -> (i32, i32) {
    %c0_i32 = arith.constant 0 : i32
    %c0_i32_0 = arith.constant 0 : i32
    %c0_i32_1 = arith.constant 0 : i32
    return %c0_i32, %c0_i32_0 : i32, i32
  }
  func.func @transform_16(%arg0: i32) -> (i32, i32) {
    %c0_i32 = arith.constant 0 : i32
    %c0_i32_0 = arith.constant 0 : i32
    %c0_i32_1 = arith.constant 0 : i32
    return %c0_i32, %c0_i32_0 : i32, i32
  }
  func.func @transform_17(%arg0: i32) -> (i32, i32) {
    %c0_i32 = arith.constant 0 : i32
    %c0_i32_0 = arith.constant 0 : i32
    %c0_i32_1 = arith.constant 0 : i32
    return %c0_i32, %c0_i32_0 : i32, i32
  }
  func.func @transform_18(%arg0: i32) -> (i32, i32) {
    %c0_i32 = arith.constant 0 : i32
    %c0_i32_0 = arith.constant 0 : i32
    %c0_i32_1 = arith.constant 0 : i32
    return %c0_i32, %c0_i32_0 : i32, i32
  }
  func.func @transform_19(%arg0: i32) -> (i32, i32, i32) {
    %c0_i32 = arith.constant 0 : i32
    %c0_i32_0 = arith.constant 0 : i32
    %c0_i32_1 = arith.constant 0 : i32
    return %arg0, %c0_i32, %c0_i32_0 : i32, i32, i32
  }
}

</mosaic_0001>

<bundles_post_ra>
// kernel: transformer_forward.1
= control target key start
LH: loop header
LB: loop body
LE: loop exit
PB: predicated region body
PF: predicated region fallthrough
CT: control target
= control target key end

     0   :  { %s4205_s0 = inlined_call_operand.vmem [shape: f32[2,8,128], index: 0, kind: input, shape index: {}]   ;;  %s4206_s1 = inlined_call_operand.vmem [shape: f32[2,1,8], index: 1, kind: input, shape index: {}]   ;;  %s4207_s2 = inlined_call_operand.hbm [shape: bf16[128,384], index: 2, kind: input, shape index: {}]   ;;  %s4208_s3 = inlined_call_operand.vmem [shape: f32[1,384], index: 3, kind: input, shape index: {}]   ;;  %s4209_s4 = inlined_call_operand.vmem [shape: bf16[128,128], index: 4, kind: input, shape index: {}]   ;;  %s4210_s5 = inlined_call_operand.vmem [shape: f32[1,128], index: 5, kind: input, shape index: {}]   ;;  %s4211_s6 = inlined_call_operand.hbm [shape: bf16[2,128,256], index: 6, kind: input, shape index: {}]   ;;  %s4212_s7 = inlined_call_operand.vmem [shape: f32[2,1,256], index: 7, kind: input, shape index: {}]   ;;  %s4213_s8 = inlined_call_operand.hbm [shape: bf16[2,256,128], index: 8, kind: input, shape index: {}]   ;;  %s4214_s9 = inlined_call_operand.vmem [shape: f32[2,1,128], index: 9, kind: input, shape index: {}]   ;;  %s4215_s10 = inlined_call_operand.vmem [shape: f32[2,1,128], index: 10, kind: input, shape index: {}]   ;;  %s4216_s11 = inlined_call_operand.vmem [shape: f32[2,1,128], index: 11, kind: input, shape index: {}]   ;;  %s4217_s12 = inlined_call_operand.vmem [shape: f32[2,1,128], index: 12, kind: input, shape index: {}]   ;;  %s4218_s13 = inlined_call_operand.vmem [shape: f32[2,1,128], index: 13, kind: input, shape index: {}]   ;;  %s4219_s14 = inlined_call_operand.vmem [shape: bf16[128,64], index: 14, kind: input, shape index: {}]   ;;  %s4220_s15 = inlined_call_operand.vmem [shape: f32[1,64], index: 15, kind: input, shape index: {}]   ;;  %s4221_s16 = inlined_call_operand.vmem [shape: f32[1,64], index: 16, kind: input, shape index: {}]   ;;  %s4222_s17 = inlined_call_operand.vmem [shape: bf16[64,128], index: 17, kind: input, shape index: {}]   ;;  %s4223_s18 = inlined_call_operand.vmem [shape: f32[1,128], index: 18, kind: input, shape index: {}]   ;;  %s4224_s19 = inlined_call_operand.vmem [shape: f32[2,8,128], index: 19, kind: output, shape index: {}]  }
   0x1   :  { %4226 = sst [smem:[#allocation10_spill]] %s4205_s0 }
   0x2   :  { %4227 = sst [smem:[#allocation11_spill]] %s4206_s1 }
   0x3   :  { %4228 = sst [smem:[#allocation12_spill]] %s4207_s2 }
   0x4   :  { %4229 = sst [smem:[#allocation13_spill]] %s4208_s3 }
   0x5   :  { %4230 = sst [smem:[#allocation14_spill]] %s4211_s6 }
   0x6   :  { %4231 = sst [smem:[#allocation15_spill]] %s4221_s16 }
   0x7   :  { %4232 = sst [smem:[#allocation16_spill]] %s4223_s18 }
   0x8   :  { %4233 = sst [smem:[#allocation17_spill]] %s4224_s19 }
   0x9   :  { %24 = vsyncpa [#allocation3], 0 }
   0xa   :  { %25 = vsyncpa [#allocation5], 0  ;;  %s3657_s0 = smov 0  }
   0xb LB: > { %4234 = sst [smem:[#allocation9_spill]] %s3541_s0  ;;  %s3666_s1 = sadd.s32 4294967295, %s3541_s0   ;;  %s3541_s0 = sphi %s3657_s0, %s31_s0  }
   0xc   : > { %s4235_s6 = sld [smem:[#allocation14_spill]]  ;;  %p2734_p0 = scmp.ge.s32.totalorder %s3541_s0, 1 }
   0xd   : > { %p471_p1 = scmp.lt.s32.totalorder %s3541_s0, 3  ;;  %p3337_p2 = scmp.eq.s32.totalorder %s3666_s1, 0 }
   0xe   : > { %s3543_s2 = smov [#allocation4]   ;;  %s4237_s3 = sld [smem:[#allocation12_spill]] }
   0xf   : > { %p3671_p3 = pnand %p2734_p0, %p471_p1  ;;  %s507_s23 = sshll.u32 %s3543_s2, 4  ;;  %s508_s23 = int_to_ptr.vmem [resolvable:$true] %s507_s23 }
  0x10   : > { %s3544_s28 = smov [#allocation2]   ;;  %s3545_s30 = smov 128  }
  0x11   : > { %p3327_p4 = pneg %p3671_p3  ;;  %s484_s29 = sshll.u32 %s3544_s28, 4  ;;  %s485_s29 = int_to_ptr.vmem [resolvable:$true] %s484_s29 }
  0x12   : > { %s505_s21 = sshll.u32 %s4235_s6, 4  ;;  %s3546_s20 = smov 8   ;;  %s506_s21 = int_to_ptr.hbm [resolvable:$true] %s505_s21 }
  0x13   : > { %p3682_p5 = pnand %p3337_p2, %p3327_p4  ;;  %s522_s24 = sshll.u32 %s4213_s8, 4  ;;  %s523_s24 = int_to_ptr.hbm [resolvable:$true] %s522_s24 }
  0x14   : > { %s482_s26 = sshll.u32 %s4237_s3, 4  ;;  %s3547_s25 = smov 192   ;;  %s483_s26 = int_to_ptr.hbm [resolvable:$true] %s482_s26 }
  0x15   : > { %3333 = dma.hbm_to_vmem [thread:$0]  (!%p3682_p5), %s506_s21, 4096, %s508_s23, [#allocation5], %s3545_s30, %s3545_s30, %s3546_s20  }
  0x16   : > { %s3548_s3 = smov 12   ;;  %s3549_s0 = smov [#allocation6]  }
  0x17   : > { %3330 = dma.hbm_to_vmem [thread:$0]  (!%p3682_p5), %s483_s26, 3072, %s485_s29, [#allocation3], %s3547_s25, %s3547_s25, %s3548_s3  }
  0x18   : > { %s524_s19 = sshll.u32 %s3549_s0, 4  ;;  %s3550_s18 = smov 64   ;;  %s525_s19 = int_to_ptr.vmem [resolvable:$true] %s524_s19 }
  0x19   : > { %s3551_s16 = smov 4   ;;  %583 = sbr.rel (%p3671_p3) target bundleno = 4464 (0x1170), region = 96 }
  0x1a   : > { %3336 = dma.hbm_to_vmem [thread:$0]  (!%p3682_p5), %s523_s24, 4096, %s525_s19, [#allocation5], %s3550_s18, %s3550_s18, %s3551_s16  }
  0x1e   : > { %3532 = dma.done.wait (%p3337_p2), [#allocation3], 3072  }
  0x1f   : > { %3534 = vsyncadd (%p3337_p2), [#allocation3], 4294964224 }
  0x20   : > { %3536 = dma.done.wait (%p3337_p2), [#allocation5], 8192  }
  0x21   : > { %3538 = vsyncadd (%p3337_p2), [#allocation5], 4294959104  ;;  %v2831_v0 = vld [vmem:[#allocation2 + $0xa8] sm:$0xf]  ;;  %v3229_v1 = vld [vmem:[#allocation2 + $0xb0] sm:$0xf0] }
  0x22   : > { %v3228_v2 = vld [vmem:[#allocation2 + $0xac] sm:$0xf]  ;;  %v3705_v3 = vor.u32 %v3229_v1, %v2831_v0  ;;  %v2833_v4 = vld [vmem:[#allocation2 + $0xb4] sm:$0xf0]  ;;  %v2819_v5 = vld [vmem:[#allocation2 + $0x90] sm:$0xf] }
  0x23   : > { %v3226_v6 = vld [vmem:[#allocation2 + $0x98] sm:$0xf0]  ;;  %v3707_v7 = vor.u32 %v3228_v2, %v2833_v4  ;;  %v3225_v8 = vld [vmem:[#allocation2 + $0x94] sm:$0xf]  ;;  %v2821_v9 = vld [vmem:[#allocation2 + $0x9c] sm:$0xf0] }
  0x24   : > { %854 = vmatpush.bf16.msra.mxu0 %v3705_v3  ;;  %v3710_v10 = vor.u32 %v3226_v6, %v2819_v5  ;;  %v3713_v11 = vor.u32 %v3225_v8, %v2821_v9  ;;  %v2807_v12 = vld [vmem:[#allocation2 + $0x78] sm:$0xf]  ;;  %v3223_v13 = vld [vmem:[#allocation2 + $0x80] sm:$0xf0]  ;;  %p651_p6 = scmp.lt.s32.totalorder %s3666_s1, 1  ;;  %s4239_s18 = sld [smem:[#allocation11_spill]] }
  0x25   : > { %867 = vmatpush.bf16.msra.mxu1 %v3707_v7  ;;  %v3222_v14 = vld [vmem:[#allocation2 + $0x7c] sm:$0xf]  ;;  %v2809_v15 = vld [vmem:[#allocation2 + $0x84] sm:$0xf0]  ;;  %v3717_v16 = vor.u32 %v3223_v13, %v2807_v12  ;;  %v2795_v18 = vld [vmem:[#allocation2 + $0x60] sm:$0xf] }
  0x26   : > { %v3720_v17 = vor.u32 %v3222_v14, %v2809_v15  ;;  %v3220_v19 = vld [vmem:[#allocation2 + $0x68] sm:$0xf0]  ;;  %s4247_s1 = smov (!%p651_p6, %s3666_s1), 1  ;;  %v3219_v20 = vld [vmem:[#allocation2 + $0x64] sm:$0xf]  ;;  %s4240_s23 = sld [smem:[#allocation10_spill]] }
  0x27   : > { %v2797_v21 = vld [vmem:[#allocation2 + $0x6c] sm:$0xf0]  ;;  %v2783_v22 = vld [vmem:[#allocation2 + $0x48] sm:$0xf]  ;;  %v3732_v23 = vor.u32 %v3220_v19, %v2795_v18  ;;  %v3217_v24 = vld [vmem:[#allocation2 + $0x50] sm:$0xf0] }
  0x28   : > { %855 = vmatpush.bf16.msra.mxu0 %v3710_v10  ;;  %v3216_v25 = vld [vmem:[#allocation2 + $0x4c] sm:$0xf]  ;;  %v3735_v26 = vor.u32 %v3219_v20, %v2797_v21  ;;  %v2785_v27 = vld [vmem:[#allocation2 + $0x54] sm:$0xf0]  ;;  %v2771_v28 = vld [vmem:[#allocation2 + $0x30] sm:$0xf]  ;;  %v3738_v30 = vor.u32 %v3217_v24, %v2783_v22 }
  0x29   : > { %868 = vmatpush.bf16.msra.mxu1 %v3713_v11  ;;  %v3214_v29 = vld [vmem:[#allocation2 + $0x38] sm:$0xf0]  ;;  %v3741_v31 = vor.u32 %v3216_v25, %v2785_v27  ;;  %v3213_v32 = vld [vmem:[#allocation2 + $0x34] sm:$0xf]  ;;  %v2773_v33 = vld [vmem:[#allocation2 + $0x3c] sm:$0xf0] }
  0x2a   : > { %s3729_s19 = scalar_lea.vmem %s4239_s18, %s4247_s1  ;;  %v3744_v34 = vor.u32 %v3214_v29, %v2771_v28  ;;  %v3747_v35 = vor.u32 %v3213_v32, %v2773_v33  ;;  %v2759_v36 = vld [vmem:[#allocation2 + $0x18] sm:$0xf]  ;;  %v3211_v37 = vld [vmem:[#allocation2 + $0x20] sm:$0xf0]  ;;  %v3210_v38 = vld [vmem:[#allocation2 + $0x1c] sm:$0xf] }
  0x2b   : > { %v2761_v39 = vld [vmem:[#allocation2 + $0x24] sm:$0xf0]  ;;  %s2743_s0 = sshll.u32 %s4247_s1, 3  ;;  %v3751_v40 = vor.u32 %v3211_v37, %v2759_v36  ;;  %v2747_v42 = vld [vmem:[#allocation2] sm:$0xf]  ;;  %s4241_s29 = sld [smem:[#allocation13_spill]] }
  0x2c   : > { %856 = vmatpush.bf16.msra.mxu0 %v3717_v16  ;;  %v3754_v41 = vor.u32 %v3210_v38, %v2761_v39  ;;  %v3208_v43 = vld [vmem:[#allocation2 + $0x8] sm:$0xf0]  ;;  %s654_s26 = scalar_lea.vmem %s4240_s23, %s2743_s0  ;;  %v3207_v44 = vld [vmem:[#allocation2 + $0x4] sm:$0xf]  ;;  %v2749_v45 = vld [vmem:[#allocation2 + $0xc] sm:$0xf0] }
  0x2d   : > { %869 = vmatpush.bf16.msra.mxu1 %v3720_v17  ;;  %v3762_v46 = vor.u32 %v3208_v43, %v2747_v42  ;;  %v3764_v47 = vld [vmem:[%s654_s26] sm:$0xff]  ;;  %v3767_v48 = vor.u32 %v3207_v44, %v2749_v45  ;;  %vm935_vm0 = vcmask 261120   ;;  %s3552_s30 = smov 32   ;;  %s3553_s20 = smov 64   ;;  %v2839_v21 = vld [vmem:[#allocation2 + $0xb0] sm:$0xf] }
  0x2e   : > { %v3771_v49 = vpack.c.bf16 %v3764_v47, %v3764_v47  ;;  %s3554_s2 = smov 96   ;;  %v3230_v22 = vld [vmem:[#allocation2 + $0xb8] sm:$0xf0]  ;;  %v2827_v24 = vld [vmem:[#allocation2 + $0x98] sm:$0xf]  ;;  %vm1012_vm1 = vcmask 64512  }
  0x2f   : > { %v3802_v25 = vor.u32 %v3230_v22, %v2839_v21  ;;  %v3227_v27 = vld [vmem:[#allocation2 + $0xa0] sm:$0xf0]  ;;  %v2815_v29 = vld [vmem:[#allocation2 + $0x80] sm:$0xf]  ;;  %v3224_v32 = vld [vmem:[#allocation2 + $0x88] sm:$0xf0] }
  0x30   : > { %857 = vmatpush.bf16.msra.mxu0 %v3732_v23  ;;  %v3805_v28 = vor.u32 %v3227_v27, %v2827_v24  ;;  %v3808_v33 = vor.u32 %v3224_v32, %v2815_v29  ;;  %v2803_v36 = vld [vmem:[#allocation2 + $0x68] sm:$0xf]  ;;  %v3221_v37 = vld [vmem:[#allocation2 + $0x70] sm:$0xf0]  ;;  %v3815_v39 = vld [vmem:[%s3729_s19] ss:$0 sm:$0xff] }
  0x31   : > { %870 = vmatpush.bf16.msra.mxu1 %v3735_v26  ;;  %v3780_v50 = vld [vmem:[%s4241_s29] sm:$0x7]  ;;  %880 = vmatpush.bf16.msra.mxu2 %v3802_v25  ;;  %v3811_v38 = vor.u32 %v3221_v37, %v2803_v36  ;;  %v2791_v42 = vld [vmem:[#allocation2 + $0x50] sm:$0xf]  ;;  %v3218_v43 = vld [vmem:[#allocation2 + $0x58] sm:$0xf0] }
  0x32   : > { %v721_v51 = vperm.slane %v3780_v50, 1  ;;  %v720_v54 = vperm.slane %v3780_v50, 0  ;;  %v3817_v45 = vor.u32 %v3218_v43, %v2791_v42  ;;  %v722_v21 = vperm.slane %v3780_v50, 2  ;;  %s4242_s21 = sld [smem:[#allocation15_spill]] }
  0x33   : > { %vm1064_vm2 = vcmask 1043456   ;;  %vm1151_vm3 = vcmask 523264   ;;  %vm1153_vm4 = vcmask 785408   ;;  %s4243_s26 = sld [smem:[#allocation16_spill]] }
  0x34   : > { %858 = vmatpush.bf16.msra.mxu0 %v3738_v30  ;;  %s4244_s29 = sld [smem:[#allocation17_spill]] }
  0x35   : > { %871 = vmatpush.bf16.msra.mxu1 %v3741_v31  ;;  %881 = vmatpush.bf16.msra.mxu2 %v3805_v28 }
  0x38   : > { %859 = vmatpush.bf16.msra.mxu0 %v3744_v34 }
  0x39   : > { %872 = vmatpush.bf16.msra.mxu1 %v3747_v35  ;;  %882 = vmatpush.bf16.msra.mxu2 %v3808_v33 }
  0x3a   : > { %s661_s24 = scalar_lea.vmem %s4244_s29, %s2743_s0 }
  0x3c   : > { %860 = vmatpush.bf16.msra.mxu0 %v3751_v40 }
  0x3d   : > { %873 = vmatpush.bf16.msra.mxu1 %v3754_v41  ;;  %883 = vmatpush.bf16.msra.mxu2 %v3811_v38 }
  0x40   : > { %861 = vmatpush.bf16.msra.mxu0 %v3762_v46 }
  0x41   : > { %874 = vmatpush.bf16.msra.mxu1 %v3767_v48  ;;  %884 = vmatpush.bf16.msra.mxu2 %v3817_v45 }
  0x43   : > { %862 = vmatmul.bf16.vlgmr.msra.gmra.mxu0 %v3771_v49 }
  0x44   : > { %875 = vmatmul.bf16.vlgmr.msra.gmra.mxu1 %v3771_v49 }
  0xc0   : > { %v863_v52 = vpop.f32.mrf.mxu0 }
  0xc1   : > { %v876_v53 = vpop.f32.mrf.mxu1  ;;  %v864_v57 = vadd.f32 %v863_v52, %v720_v54 }
  0xc2   : > { %v877_v55 = vadd.f32 %v876_v53, %v721_v51 }
  0xc3   : > { %v903_v61 = vpack.c.bf16 %v864_v57, %v864_v57 }
  0xc4   : > { %914 = vrot.lane.b32.xlu2 %v877_v55, %s3552_s30  ;;  %911 = vrot.lane.b32.xlu1 %v877_v55, %s3553_s20  ;;  %v917_v56 = vpack.c.bf16 %v877_v55, %v877_v55 }
  0xc5   : > { %908 = vrot.lane.b32.xlu0 %v877_v55, %s3554_s2  ;;  %v2779_v55 = vld [vmem:[#allocation2 + $0x38] sm:$0xf] }
  0xc6   : > { %v940_v58 = vsel %vm935_vm0, %v917_v56, 0  ;;  %v3215_v56 = vld [vmem:[#allocation2 + $0x40] sm:$0xf0] }
  0xc7   : > { %949 = vmatpush.bf16.xpose.msra.mxu3 %v940_v58 }
  0xc8   : > { %v865_v59 = vpop.f32.mrf.mxu0 }
  0xc9   : > { %v878_v60 = vpop.f32.mrf.mxu1  ;;  %v2767_v59 = vld [vmem:[#allocation2 + $0x20] sm:$0xf] }
  0xca   : > { %v3212_v60 = vld [vmem:[#allocation2 + $0x28] sm:$0xf0] }
  0xcc   : > { %900 = vrot.lane.b32.xlu2 %v864_v57, %s3552_s30  ;;  %897 = vrot.lane.b32.xlu1 %v864_v57, %s3553_s20 }
  0xcd   : > { %894 = vrot.lane.b32.xlu0 %v864_v57, %s3554_s2  ;;  %v3822_v57 = vor.u32 %v3215_v56, %v2779_v55 }
  0xce   : > { %2841 = vmatmul.msk.bf16.vlgmr.msra.gmra.mxu3 %vm935_vm0, %v903_v61  ;;  %v2755_v61 = vld [vmem:[#allocation2 + $0x8] sm:$0xf] }
  0xcf   : > { %885 = vmatpush.bf16.msra.mxu2 %v3822_v57 }
 0x11e   : > { %v915_v62 = vpop.permute.xlu2 %914 }
 0x11f   : > { %v920_v63 = vpack.c.bf16 %v915_v62, %v915_v62 }
 0x121   : > { %v997_v0 = vsel %vm935_vm0, %v920_v63, 0  ;;  %v3826_v63 = vor.u32 %v3212_v60, %v2767_v59 }
 0x122   : > { %1006 = vmatpush.bf16.xpose.msrb.mxu0 %v997_v0  ;;  %v3209_v0 = vld [vmem:[#allocation2 + $0x10] sm:$0xf0] }
 0x123   : > { %886 = vmatpush.bf16.msra.mxu2 %v3826_v63 }
 0x126   : > { %v901_v1 = vpop.permute.xlu2 %900 }
 0x127   : > { %v906_v2 = vpack.c.bf16 %v901_v1, %v901_v1  ;;  %v3829_v1 = vor.u32 %v3209_v0, %v2755_v61 }
 0x129   : > { %2844 = vmatmul.msk.bf16.vlgmr.msrb.gmra.mxu0 %vm935_vm0, %v906_v2  ;;  %887 = vmatpush.bf16.msra.mxu2 %v3829_v1 }
 0x12c   : > { %888 = vmatmul.bf16.vlgmr.msra.gmra.mxu2 %v3771_v49 }
 0x136   : > { %v912_v4 = vpop.permute.xlu1 %911 }
 0x137   : > { %v919_v5 = vpack.c.bf16 %v912_v4, %v912_v4  ;;  %v909_v6 = vpop.permute.xlu0 %908 }
 0x138   : > { %v918_v8 = vpack.c.bf16 %v909_v6, %v909_v6 }
 0x139   : > { %v978_v9 = vsel %vm935_vm0, %v919_v5, 0 }
 0x13a   : > { %v959_v12 = vsel %vm935_vm0, %v918_v8, 0 }
 0x13b   : > { %968 = vmatpush.bf16.xpose.msrb.mxu3 %v959_v12 }
 0x13e   : > { %v898_v15 = vpop.permute.xlu1 %897 }
 0x13f   : > { %v895_v13 = vpop.permute.xlu0 %894  ;;  %v905_v18 = vpack.c.bf16 %v898_v15, %v898_v15 }
 0x140   : > { %v904_v14 = vpack.c.bf16 %v895_v13, %v895_v13 }
 0x142   : > { %2842 = vmatmul.msk.bf16.vlgmr.msrb.gmra.mxu3 %vm935_vm0, %v904_v14 }
 0x143   : > { %987 = vmatpush.bf16.xpose.msra.mxu3 %v978_v9 }
 0x151   : > { %v951_v19 = vpop.f32.mrf.mxu3 }
 0x152   : > { %2843 = vmatmul.msk.bf16.vlgmr.msra.gmra.mxu3 %vm935_vm0, %v905_v18  ;;  %v952_v58 = vadd.f32 %v3815_v39, %v951_v19 }
 0x154   : > { %v1013_v2 = vsel %vm1012_vm1, %v952_v58, -inf }
 0x159   : > { %v953_v20 = vpop.f32.mrf.mxu3 }
 0x1a6   : > { %v1008_v44 = vpop.f32.mrf.mxu0 }
 0x1a7   : > { %v1009_v52 = vadd.f32 %v3815_v39, %v1008_v44 }
 0x1a9   : > { %v1022_v53 = vsel %vm1012_vm1, %v1009_v52, -inf }
 0x1aa   : > { %1023 = vmax.xlane.f32.xlu2 %v1022_v53 }
 0x1ae   : > { %v1010_v62 = vpop.f32.mrf.mxu0 }
 0x1af   : > { %v889_v22 = vpop.f32.mrf.mxu2 }
 0x1b0   : > { %v890_v24 = vadd.f32 %v889_v22, %v722_v21 }
 0x1b2   : > { %1014 = vmax.xlane.f32.xlu2 %v1013_v2  ;;  %v931_v53 = vpack.c.bf16 %v890_v24, %v890_v24 }
 0x1b4   : > { %v1066_v55 = vsel %vm1064_vm2, %v931_v53, 0 }
 0x1b5   : > { %1075 = vmatpush.bf16.msrb.mxu1 %v1066_v55 }
 0x1b7   : > { %v891_v36 = vpop.f32.mrf.mxu2 }
 0x1c5   : > { %v970_v4 = vpop.f32.mrf.mxu3 }
 0x1c6   : > { %v971_v5 = vadd.f32 %v3815_v39, %v970_v4 }
 0x1c8   : > { %v1016_v6 = vsel %vm1012_vm1, %v971_v5, -inf }
 0x1c9   : > { %1017 = vmax.xlane.f32.xlu0 %v1016_v6 }
 0x1ca   : > { %922 = vrot.lane.b32.xlu2 %v890_v24, %s3554_s2 }
 0x1cd   : > { %v972_v8 = vpop.f32.mrf.mxu3 }
 0x1d5   : > { %v989_v9 = vpop.f32.mrf.mxu3 }
 0x1d6   : > { %v990_v12 = vadd.f32 %v3815_v39, %v989_v9 }
 0x1d8   : > { %v1019_v13 = vsel %vm1012_vm1, %v990_v12, -inf }
 0x1d9   : > { %1020 = vmax.xlane.f32.xlu1 %v1019_v13 }
 0x1dd   : > { %v991_v14 = vpop.f32.mrf.mxu3 }
 0x21d   : > { %v1024_v15 = vpop.xlane.xlu2 %1023 }
 0x21e   : > { %v1028_v18 = vsub.f32 %v1009_v52, %v1024_v15 }
 0x220   : > { %v1035_v19 = vmul.f32 1.442695, %v1028_v18 }
 0x222   : > { %3380 = vpow2.f32 %v1035_v19 }
 0x225   : > { %v1015_v60 = vpop.xlane.xlu2 %1014 }
 0x226   : > { %v1025_v61 = vsub.f32 %v952_v58, %v1015_v60 }
 0x228   : > { %v3381_v20 = vpop.eup %3380  ;;  %v1029_v62 = vmul.f32 1.442695, %v1025_v61 }
 0x229   : > { %v1046_v49 = vsel %vm1012_vm1, %v3381_v20, 0.0 }
 0x22a   : > { %1047 = vadd.xlane.f32.xlu1 %v1046_v49 }
 0x22d   : > { %v923_v4 = vpop.permute.xlu2 %922 }
 0x23c   : > { %v1018_v27 = vpop.xlane.xlu0 %1017 }
 0x23d   : > { %v1026_v29 = vsub.f32 %v971_v5, %v1018_v27  ;;  %v932_v5 = vpack.c.bf16 %v923_v4, %v923_v4  ;;  %v3868_v4 = vld [vmem:[%s4209_s4 + $0x30] sm:$0xff] }
 0x23f   : > { %v1031_v32 = vmul.f32 1.442695, %v1026_v29  ;;  %v1085_v6 = vsel %vm1064_vm2, %v932_v5, 0  ;;  %v3874_v5 = vld [vmem:[%s4209_s4 + $0x28] sm:$0xff] }
 0x240   : > { %1094 = vmatpush.bf16.msrb.mxu2 %v1085_v6  ;;  %v3880_v6 = vld [vmem:[%s4209_s4 + $0x20] sm:$0xff] }
 0x241   : > { %3382 = vpow2.f32 %v1031_v32 }
 0x247   : > { %v3383_v37 = vpop.eup %3382 }
 0x248   : > { %v1040_v42 = vsel %vm1012_vm1, %v3383_v37, 0.0 }
 0x249   : > { %1041 = vadd.xlane.f32.xlu0 %v1040_v42 }
 0x24c   : > { %v1021_v43 = vpop.xlane.xlu1 %1020 }
 0x24d   : > { %v1027_v44 = vsub.f32 %v990_v12, %v1021_v43 }
 0x24f   : > { %v1033_v52 = vmul.f32 1.442695, %v1027_v44 }
 0x251   : > { %3384 = vpow2.f32 %v1033_v52 }
 0x252   : > { %3386 = vpow2.f32 %v1029_v62 }
 0x257   : > { %v3385_v56 = vpop.eup %3384 }
 0x258   : > { %v1043_v59 = vsel %vm1012_vm1, %v3385_v56, 0.0  ;;  %v3387_v0 = vpop.eup %3386 }
 0x259   : > { %1044 = vadd.xlane.f32.xlu1 %v1043_v59  ;;  %v1037_v2 = vsel %vm1012_vm1, %v3387_v0, 0.0 }
 0x25d   : > { %925 = vrot.lane.b32.xlu0 %v890_v24, %s3553_s20 }
 0x272   : > { %928 = vrot.lane.b32.xlu1 %v890_v24, %s3552_s30 }
 0x287   : > { %1038 = vadd.xlane.f32.xlu0 %v1037_v2 }
 0x29d   : > { %v1048_v12 = vpop.xlane.xlu1 %1047 }
 0x2bc   : > { %v1042_v8 = vpop.xlane.xlu0 %1041 }
 0x2bd   : > { %3388 = vrcp.f32 %v1042_v8  ;;  %v3886_v8 = vld [vmem:[%s4209_s4 + $0x18] sm:$0xff] }
 0x2c3   : > { %v3389_v9 = vpop.eup %3388 }
 0x2c4   : > { %v1054_v13 = vmul.f32 %v3389_v9, %v3383_v37  ;;  %v3892_v9 = vld [vmem:[%s4209_s4 + $0x10] sm:$0xff] }
 0x2c6   : > { %v1058_v14 = vpack.c.bf16 %v1054_v13, %v1054_v13  ;;  %v3904_v13 = vld [vmem:[%s4209_s4] sm:$0xff] }
 0x2c8   : > { %2846 = vmatmul.msk.bf16.vlgmr.msrb.gmra.mxu2 %vm1012_vm1, %v1058_v14 }
 0x2cc   : > { %v1045_v58 = vpop.xlane.xlu1 %1044 }
 0x2cd   : > { %3390 = vrcp.f32 %v1045_v58 }
 0x2ce   : > { %3392 = vrcp.f32 %v1048_v12  ;;  %v3898_v12 = vld [vmem:[%s4209_s4 + $0x8] sm:$0xff] }
 0x2cf   : > { %v926_v15 = vpop.permute.xlu0 %925 }
 0x2d0   : > { %v933_v18 = vpack.c.bf16 %v926_v15, %v926_v15 }
 0x2d2   : > { %v1104_v19 = vsel %vm1064_vm2, %v933_v18, 0 }
 0x2d3   : > { %v3391_v49 = vpop.eup %3390  ;;  %1113 = vmatpush.bf16.msrb.mxu3 %v1104_v19 }
 0x2d4   : > { %v1055_v22 = vmul.f32 %v3391_v49, %v3385_v56  ;;  %v3393_v27 = vpop.eup %3392 }
 0x2d5   : > { %v1056_v32 = vmul.f32 %v3393_v27, %v3381_v20 }
 0x2d6   : > { %v1059_v24 = vpack.c.bf16 %v1055_v22, %v1055_v22 }
 0x2d7   : > { %v1060_v42 = vpack.c.bf16 %v1056_v32, %v1056_v32 }
 0x2d8   : > { %2847 = vmatmul.msk.bf16.vlgmr.msrb.gmra.mxu3 %vm1012_vm1, %v1059_v24  ;;  %v3913_v24 = vld [vmem:[%s4210_s5] ss:$0 sm:$0xff] }
 0x2e4   : > { %v929_v29 = vpop.permute.xlu1 %928 }
 0x2e5   : > { %v934_v36 = vpack.c.bf16 %v929_v29, %v929_v29 }
 0x2e7   : > { %v1123_v37 = vsel %vm1064_vm2, %v934_v36, 0 }
 0x2e8   : > { %1132 = vmatpush.bf16.msra.mxu0 %v1123_v37  ;;  %v3555_v37 = vmov 128.0  }
 0x2eb   : > { %2848 = vmatmul.msk.bf16.vlgmr.msra.gmra.mxu0 %vm1012_vm1, %v1060_v42  ;;  %v2939_v42 = vld [vmem:[#allocation4 + $0x70] sm:$0xf] }
 0x2fa   : > { %v1039_v43 = vpop.xlane.xlu0 %1038 }
 0x2fb   : > { %3394 = vrcp.f32 %v1039_v43  ;;  %v3254_v43 = vld [vmem:[#allocation4 + $0x74] sm:$0xf0] }
 0x2fc   : > { %3396 = vrcp.f32 %v3555_v37  ;;  %v3249_v37 = vld [vmem:[#allocation4 + $0x54] sm:$0xf] }
 0x301   : > { %v3395_v44 = vpop.eup %3394 }
 0x302   : > { %v1053_v52 = vmul.f32 %v3395_v44, %v3387_v0  ;;  %v3862_v0 = vld [vmem:[%s4209_s4 + $0x38] sm:$0xff]  ;;  %v3253_v44 = vld [vmem:[#allocation4 + $0x74] sm:$0xf] }
 0x303   : > { %1207 = vmatpush.bf16.msra.mxu1 %v3862_v0 }
 0x304   : > { %v1057_v53 = vpack.c.bf16 %v1053_v52, %v1053_v52  ;;  %v2940_v52 = vor.u32 %v3254_v43, %v2939_v42  ;;  %v2925_v43 = vld [vmem:[#allocation4 + $0x58] sm:$0xf0] }
 0x306   : > { %2845 = vmatmul.msk.bf16.vlgmr.msrb.gmra.mxu1 %vm1012_vm1, %v1057_v53  ;;  %v2941_v53 = vld [vmem:[#allocation4 + $0x78] sm:$0xf0]  ;;  %1361 = vmatpush.bf16.msra.mxu2 %v2940_v52  ;;  %v3248_v52 = vld [vmem:[#allocation4 + $0x44] sm:$0xf0] }
 0x307   : > { %1208 = vmatpush.bf16.msra.mxu1 %v3868_v4 }
 0x30b   : > { %1209 = vmatpush.bf16.msra.mxu1 %v3874_v5 }
 0x30f   : > { %1210 = vmatpush.bf16.msra.mxu1 %v3880_v6 }
 0x313   : > { %1211 = vmatpush.bf16.msra.mxu1 %v3886_v8 }
 0x317   : > { %1212 = vmatpush.bf16.msra.mxu1 %v3892_v9 }
 0x31b   : > { %1213 = vmatpush.bf16.msra.mxu1 %v3898_v12 }
 0x31f   : > { %1214 = vmatpush.bf16.msra.mxu1 %v3904_v13 }
 0x34b   : > { %v1096_v55 = vpop.f32.mrf.mxu2 }
 0x34c   : > { %1139 = vrot.lane.b32.xlu2 %v1096_v55, %s3552_s30  ;;  %v2944_v55 = vor.u32 %v3253_v44, %v2941_v53  ;;  %v2928_v44 = vor.u32 %v3249_v37, %v2925_v43  ;;  %v3247_v53 = vld [vmem:[#allocation4 + $0x44] sm:$0xf]  ;;  %v3241_v37 = vld [vmem:[#allocation4 + $0x14] sm:$0xf]  ;;  %v2893_v43 = vld [vmem:[#allocation4 + $0x18] sm:$0xf0] }
 0x34e   : > { %1374 = vmatpush.bf16.msra.mxu3 %v2944_v55 }
 0x353   : > { %v1098_v56 = vpop.f32.mrf.mxu2 }
 0x354   : > { %v3397_v56 = vpop.eup %3396 }
 0x355   : > { %vm1230_vm5 = vweird.f32 %v3397_v56 }
 0x35b   : > { %v1115_v59 = vpop.f32.mrf.mxu3 }
 0x35c   : > { %1143 = vrot.lane.b32.xlu2 %v1115_v59, %s3553_s20  ;;  %v1226_v59 = vmul.f32 128.0, %v3397_v56 }
 0x363   : > { %v1117_v20 = vpop.f32.mrf.mxu3 }
 0x364   : > { %v1227_v20 = vsub.f32 1.0, %v1226_v59 }
 0x368   : > { %v1134_v60 = vpop.f32.mrf.mxu0 }
 0x369   : > { %1147 = vrot.lane.b32.xlu1 %v1134_v60, %s3554_s2  ;;  %v1228_v60 = vmul.f32 %v3397_v56, %v1227_v20  ;;  %v2907_v20 = vld [vmem:[#allocation4 + $0x30] sm:$0xf] }
 0x370   : > { %v1136_v61 = vpop.f32.mrf.mxu0 }
 0x371   : > { %v1229_v61 = vadd.f32 %v3397_v56, %v1228_v60  ;;  %v3246_v60 = vld [vmem:[#allocation4 + $0x34] sm:$0xf0] }
 0x383   : > { %v1077_v62 = vpop.f32.mrf.mxu1 }
 0x38b   : > { %v1079_v2 = vpop.f32.mrf.mxu1 }
 0x3a6   : > { %v1140_v14 = vpop.permute.xlu2 %1139 }
 0x3a7   : > { %v1150_v15 = vsel %vm935_vm0, %v1077_v62, %v1140_v14  ;;  %v3917_v62 = vsel %vm1230_vm5, %v3397_v56, %v1229_v61  ;;  %v2917_v56 = vld [vmem:[#allocation4 + $0x48] sm:$0xf0]  ;;  %v3245_v61 = vld [vmem:[#allocation4 + $0x34] sm:$0xf] }
 0x3a8   : > { %v2920_v59 = vor.u32 %v3247_v53, %v2917_v56  ;;  %v3239_v53 = vld [vmem:[#allocation4 + $0x4] sm:$0xf]  ;;  %v2885_v56 = vld [vmem:[#allocation4 + $0x8] sm:$0xf0] }
 0x3b6   : > { %v1144_v58 = vpop.permute.xlu2 %1143 }
 0x3b7   : > { %v1152_v18 = vsel %vm1151_vm3, %v1150_v15, %v1144_v58  ;;  %v2931_v15 = vld [vmem:[#allocation4 + $0x60] sm:$0xf] }
 0x3db   : > { %v1148_v19 = vpop.permute.xlu1 %1147 }
 0x3dc   : > { %v1154_v49 = vsel %vm1153_vm4, %v1152_v18, %v1148_v19  ;;  %v3252_v18 = vld [vmem:[#allocation4 + $0x64] sm:$0xf0]  ;;  %v3251_v19 = vld [vmem:[#allocation4 + $0x64] sm:$0xf] }
 0x3dd   : > { %v1155_v22 = vpack.c.bf16 %v1154_v49, %v1154_v49  ;;  %v2932_v49 = vor.u32 %v3252_v18, %v2931_v15  ;;  %v2899_v15 = vld [vmem:[#allocation4 + $0x20] sm:$0xf]  ;;  %v3244_v18 = vld [vmem:[#allocation4 + $0x24] sm:$0xf0] }
 0x3df   : > { %1215 = vmatmul.bf16.vlgmr.msra.gmra.mxu1 %v1155_v22  ;;  %v2933_v22 = vld [vmem:[#allocation4 + $0x68] sm:$0xf0]  ;;  %1362 = vmatpush.bf16.msra.mxu2 %v2932_v49  ;;  %v2900_v49 = vor.u32 %v3244_v18, %v2899_v15  ;;  %v3269_v15 = vld [vmem:[#allocation6 + $0x70] sm:$0xff] }
 0x45c   : > { %v1216_v27 = vpop.f32.mrf.mxu1 }
 0x45d   : > { %v1217_v29 = vadd.f32 %v3913_v24, %v1216_v27  ;;  %v2936_v27 = vor.u32 %v3251_v19, %v2933_v22  ;;  %v3243_v19 = vld [vmem:[#allocation4 + $0x24] sm:$0xf]  ;;  %v2901_v22 = vld [vmem:[#allocation4 + $0x28] sm:$0xf0] }
 0x45f   : > { %v1220_v32 = vadd.f32 %v1217_v29, %v3764_v47  ;;  %1375 = vmatpush.bf16.msra.mxu3 %v2936_v27  ;;  %v2923_v29 = vld [vmem:[#allocation4 + $0x50] sm:$0xf]  ;;  %v2904_v27 = vor.u32 %v3243_v19, %v2901_v22  ;;  %v3260_v22 = vld [vmem:[#allocation6 + $0x28] sm:$0xff] }
 0x461   : > { %1223 = vadd.xlane.f32.xlu2 %v1220_v32 }
 0x463   : > { %1376 = vmatpush.bf16.msra.mxu3 %v2928_v44  ;;  %v2896_v44 = vor.u32 %v3241_v37, %v2893_v43  ;;  %v3259_v43 = vld [vmem:[#allocation6 + $0x20] sm:$0xff] }
 0x464   : > { %v1218_v36 = vpop.f32.mrf.mxu1 }
 0x465   : > { %v3250_v36 = vld [vmem:[#allocation4 + $0x54] sm:$0xf0] }
 0x466   : > { %v2924_v42 = vor.u32 %v3250_v36, %v2923_v29  ;;  %v2891_v29 = vld [vmem:[#allocation4 + $0x10] sm:$0xf]  ;;  %v3242_v36 = vld [vmem:[#allocation4 + $0x14] sm:$0xf0] }
 0x467   : > { %1377 = vmatpush.bf16.msra.mxu3 %v2920_v59  ;;  %v2888_v59 = vor.u32 %v3239_v53, %v2885_v56 }
 0x468   : > { %1363 = vmatpush.bf16.msra.mxu2 %v2924_v42  ;;  %v2892_v42 = vor.u32 %v3242_v36, %v2891_v29 }
 0x4d4   : > { %v1224_v47 = vpop.xlane.xlu2 %1223 }
 0x4d5   : > { %v1232_v2 = vmul.f32 %v3917_v62, %v1224_v47  ;;  %v2908_v47 = vor.u32 %v3246_v60, %v2907_v20 }
 0x4d7   : > { %v3920_v14 = vsub.f32 %v1220_v32, %v1232_v2  ;;  %v2915_v32 = vld [vmem:[#allocation4 + $0x40] sm:$0xf]  ;;  %v2909_v2 = vld [vmem:[#allocation4 + $0x38] sm:$0xf0] }
 0x4d8   : > { %v2916_v55 = vor.u32 %v3248_v52, %v2915_v32  ;;  %v2883_v32 = vld [vmem:[#allocation4] sm:$0xf]  ;;  %v3240_v52 = vld [vmem:[#allocation4 + $0x4] sm:$0xf0] }
 0x4d9   : > { %v1234_v58 = vmul.f32 %v3920_v14, %v3920_v14 }
 0x4da   : > { %1364 = vmatpush.bf16.msra.mxu2 %v2916_v55  ;;  %v2884_v55 = vor.u32 %v3240_v52, %v2883_v32 }
 0x4db   : > { %1235 = vadd.xlane.f32.xlu1 %v1234_v58  ;;  %v2912_v58 = vor.u32 %v3245_v61, %v2909_v2 }
 0x4dd   : > { %1378 = vmatpush.bf16.msra.mxu3 %v2912_v58 }
 0x4de   : > { %1365 = vmatpush.bf16.msra.mxu2 %v2908_v47 }
 0x4e1   : > { %1379 = vmatpush.bf16.msra.mxu3 %v2904_v27  ;;  %v3268_v27 = vld [vmem:[#allocation6 + $0x68] sm:$0xff] }
 0x4e2   : > { %1366 = vmatpush.bf16.msra.mxu2 %v2900_v49 }
 0x4e5   : > { %1380 = vmatpush.bf16.msra.mxu3 %v2896_v44  ;;  %v3267_v44 = vld [vmem:[#allocation6 + $0x60] sm:$0xff] }
 0x4e6   : > { %1367 = vmatpush.bf16.msra.mxu2 %v2892_v42 }
 0x4e9   : > { %1381 = vmatpush.bf16.msra.mxu3 %v2888_v59 }
 0x4ea   : > { %1368 = vmatpush.bf16.msra.mxu2 %v2884_v55 }
 0x4ed   : > { %1680 = vmatpush.bf16.msrb.mxu3 %v3707_v7 }
 0x4ee   : > { %1667 = vmatpush.bf16.msrb.mxu2 %v3705_v3 }
 0x4f1   : > { %1681 = vmatpush.bf16.msrb.mxu3 %v3713_v11 }
 0x4f2   : > { %1668 = vmatpush.bf16.msrb.mxu2 %v3710_v10 }
 0x4f5   : > { %1682 = vmatpush.bf16.msrb.mxu3 %v3720_v17  ;;  %v3367_v17 = vld [vmem:[%s4215_s10] ss:$0 sm:$0xff] }
 0x4f6   : > { %1669 = vmatpush.bf16.msrb.mxu2 %v3717_v16 }
 0x4f9   : > { %1683 = vmatpush.bf16.msrb.mxu3 %v3735_v26 }
 0x4fa   : > { %1670 = vmatpush.bf16.msrb.mxu2 %v3732_v23 }
 0x4fd   : > { %1684 = vmatpush.bf16.msrb.mxu3 %v3741_v31 }
 0x4fe   : > { %1671 = vmatpush.bf16.msrb.mxu2 %v3738_v30  ;;  %v3368_v30 = vld [vmem:[%s4216_s11] ss:$0 sm:$0xff] }
 0x501   : > { %1685 = vmatpush.bf16.msrb.mxu3 %v3747_v35 }
 0x502   : > { %1672 = vmatpush.bf16.msrb.mxu2 %v3744_v34 }
 0x505   : > { %1686 = vmatpush.bf16.msrb.mxu3 %v3754_v41  ;;  %v3270_v41 = vld [vmem:[#allocation6 + $0x78] sm:$0xff] }
 0x506   : > { %1673 = vmatpush.bf16.msrb.mxu2 %v3751_v40  ;;  %v3262_v40 = vld [vmem:[#allocation6 + $0x38] sm:$0xff]  ;;  %1622 = vmatpush.bf16.msrb.mxu1 %v3270_v41 }
 0x507   : > { %1609 = vmatpush.bf16.msrb.mxu0 %v3262_v40 }
 0x509   : > { %1687 = vmatpush.bf16.msrb.mxu3 %v3767_v48 }
 0x50a   : > { %1674 = vmatpush.bf16.msrb.mxu2 %v3762_v46  ;;  %v3261_v46 = vld [vmem:[#allocation6 + $0x30] sm:$0xff]  ;;  %1623 = vmatpush.bf16.msrb.mxu1 %v3269_v15 }
 0x50b   : > { %1610 = vmatpush.bf16.msrb.mxu0 %v3261_v46  ;;  %v3264_v46 = vld [vmem:[#allocation6 + $0x48] sm:$0xff] }
 0x50e   : > { %1624 = vmatpush.bf16.msrb.mxu1 %v3268_v27 }
 0x50f   : > { %1611 = vmatpush.bf16.msrb.mxu0 %v3260_v22 }
 0x512   : > { %1625 = vmatpush.bf16.msrb.mxu1 %v3267_v44 }
 0x513   : > { %1612 = vmatpush.bf16.msrb.mxu0 %v3259_v43  ;;  %v3263_v43 = vld [vmem:[#allocation6 + $0x40] sm:$0xff] }
 0x54e   : > { %v1236_v20 = vpop.xlane.xlu1 %1235 }
 0x54f   : > { %v1237_v60 = vmul.f32 %v1236_v20, %v3917_v62 }
 0x551   : > { %v1238_v61 = vadd.f32 1e-05, %v1237_v60 }
 0x553   : > { %3398 = vrsqrt.f32 %v1238_v61  ;;  %vm1245_vm7 = vweird.f32 %v1238_v61 }
 0x559   : > { %v3399_v3 = vpop.eup %3398 }
 0x55a   : > { %v1240_v47 = vmul.f32 %v3399_v3, %v1238_v61  ;;  %vm1246_vm6 = vweird.f32 %v3399_v3  ;;  %v3258_v61 = vld [vmem:[#allocation6 + $0x18] sm:$0xff] }
 0x55b   : > { %vm1247_vm8 = vmor %vm1245_vm7, %vm1246_vm6  ;;  %1613 = vmatpush.bf16.msrb.mxu0 %v3258_v61 }
 0x55c   : > { %v1241_v7 = vmul.f32 %v3399_v3, %v1240_v47 }
 0x55e   : > { %v1242_v10 = vmul.f32 0.5, %v1241_v7 }
 0x560   : > { %v1243_v11 = vsub.f32 1.5, %v1242_v10 }
 0x562   : > { %v1244_v16 = vmul.f32 %v3399_v3, %v1243_v11 }
 0x564   : > { %v1248_v23 = vsel %vm1247_vm8, %v3399_v3, %v1244_v16  ;;  %v3266_v3 = vld [vmem:[#allocation6 + $0x58] sm:$0xff] }
 0x565   : > { %v1249_v26 = vmul.f32 %v1248_v23, %v3920_v14  ;;  %v1275_v14 = vld [vmem:[%s4212_s7] sm:$0x3]  ;;  %1626 = vmatpush.bf16.msrb.mxu1 %v3266_v3 }
 0x566   : > { %v1277_v2 = vperm.slane %v1275_v14, 0  ;;  %v1278_v58 = vperm.slane %v1275_v14, 1 }
 0x567   : > { %v1253_v31 = vmul.f32 %v3367_v17, %v1249_v26  ;;  %v3257_v26 = vld [vmem:[#allocation6 + $0x10] sm:$0xff] }
 0x568   : > { %1614 = vmatpush.bf16.msrb.mxu0 %v3257_v26 }
 0x569   : > { %v3948_v34 = vadd.f32 %v3368_v30, %v1253_v31  ;;  %v3265_v30 = vld [vmem:[#allocation6 + $0x50] sm:$0xff] }
 0x56a   : > { %1627 = vmatpush.bf16.msrb.mxu1 %v3265_v30 }
 0x56b   : > { %v1258_v35 = vpack.c.bf16 %v3948_v34, %v3948_v34 }
 0x56d   : > { %1369 = vmatmul.bf16.vlgmr.msra.gmra.mxu2 %v1258_v35  ;;  %1382 = vmatmul.bf16.vlgmr.msra.gmra.mxu3 %v1258_v35 }
 0x56e   : > { %1628 = vmatpush.bf16.msrb.mxu1 %v3264_v46 }
 0x572   : > { %1629 = vmatpush.bf16.msrb.mxu1 %v3263_v43 }
 0x5f0   : > { %v1370_v48 = vpop.f32.mrf.mxu2  ;;  %v1383_v18 = vpop.f32.mrf.mxu3 }
 0x5f1   : > { %v3955_v19 = vadd.f32 %v1370_v48, %v1277_v2  ;;  %v3957_v49 = vadd.f32 %v1383_v18, %v1278_v58  ;;  %v3256_v58 = vld [vmem:[#allocation6 + $0x8] sm:$0xff] }
 0x5f2   : > { %1615 = vmatpush.bf16.msrb.mxu0 %v3256_v58 }
 0x5f3   : > { %v3960_v29 = vmul.f32 0.70710677, %v3955_v19  ;;  %v3963_v36 = vmul.f32 0.70710677, %v3957_v49 }
 0x5f5   : > { %v1391_v37 = vmul.f32 %v3960_v29, %v3960_v29  ;;  %v1431_v42 = vmul.f32 %v3963_v36, %v3963_v36 }
 0x5f7   : > { %v3969_v32 = vmin.f32 %v1391_v37, 16.0  ;;  %v3971_v52 = vmin.f32 %v1431_v42, 16.0  ;;  %v3255_v42 = vld [vmem:[#allocation6] sm:$0xff] }
 0x5f8   : > { %v1372_v53 = vpop.f32.mrf.mxu2  ;;  %v1385_v55 = vpop.f32.mrf.mxu3  ;;  %1616 = vmatpush.bf16.msrb.mxu0 %v3255_v42 }
 0x5f9   : > { %v1393_v56 = vmul.f32 2.1237322e-06, %v3969_v32  ;;  %v1404_v59 = vmul.f32 3.8918573e-05, %v3969_v32  ;;  %v1433_v20 = vmul.f32 2.1237322e-06, %v3971_v52 }
 0x5fa   : > { %v1444_v60 = vmul.f32 3.8918573e-05, %v3971_v52 }
 0x5fb   : > { %v1394_v47 = vadd.f32 0.00028619796, %v1393_v56  ;;  %v1405_v7 = vadd.f32 0.001143296, %v1404_v59  ;;  %v1434_v10 = vadd.f32 0.00028619796, %v1433_v20 }
 0x5fc   : > { %v1445_v11 = vadd.f32 0.001143296, %v1444_v60  ;;  %1693 = vmatpush.bf16.msra.mxu0 %v3802_v25 }
 0x5fd   : > { %v1395_v16 = vmul.f32 %v1394_v47, %v3969_v32  ;;  %v1406_v17 = vmul.f32 %v1405_v7, %v3969_v32  ;;  %v1435_v23 = vmul.f32 %v1434_v10, %v3971_v52 }
 0x5fe   : > { %v1446_v31 = vmul.f32 %v1445_v11, %v3971_v52 }
 0x5ff   : > { %v1396_v35 = vadd.f32 0.0036580483, %v1395_v16  ;;  %v1407_v40 = vadd.f32 0.014752088, %v1406_v17  ;;  %v1436_v2 = vadd.f32 0.0036580483, %v1435_v23 }
 0x600   : > { %v1447_v41 = vadd.f32 0.014752088, %v1446_v31  ;;  %1694 = vmatpush.bf16.msra.mxu0 %v3805_v28 }
 0x601   : > { %v1408_v14 = vmul.f32 %v1407_v40, %v3969_v32  ;;  %v1397_v48 = vmul.f32 %v1396_v35, %v3969_v32  ;;  %v1437_v37 = vmul.f32 %v1436_v2, %v3971_v52 }
 0x602   : > { %v1448_v15 = vmul.f32 %v1447_v41, %v3971_v52 }
 0x603   : > { %v1409_v18 = vadd.f32 0.112945676, %v1408_v14  ;;  %v1398_v53 = vadd.f32 0.05243302, %v1397_v48  ;;  %v1438_v20 = vadd.f32 0.05243302, %v1437_v37 }
 0x604   : > { %v1449_v22 = vadd.f32 0.112945676, %v1448_v15  ;;  %1695 = vmatpush.bf16.msra.mxu0 %v3808_v33 }
 0x605   : > { %v1410_v27 = vmul.f32 %v1409_v18, %v3969_v32  ;;  %v1399_v61 = vmul.f32 %v1398_v53, %v3969_v32  ;;  %v1439_v7 = vmul.f32 %v1438_v20, %v3971_v52 }
 0x606   : > { %v1450_v44 = vmul.f32 %v1449_v22, %v3971_v52 }
 0x607   : > { %v1411_v55 = vadd.f32 0.4994258, %v1410_v27  ;;  %v1400_v10 = vadd.f32 0.18741608, %v1399_v61  ;;  %v1440_v11 = vadd.f32 0.18741608, %v1439_v7 }
 0x608   : > { %v1451_v56 = vadd.f32 0.4994258, %v1450_v44  ;;  %1696 = vmatpush.bf16.msra.mxu0 %v3811_v38 }
 0x609   : > { %v1412_v59 = vmul.f32 %v1411_v55, %v3969_v32  ;;  %v1401_v17 = vmul.f32 %v1400_v10, %v3969_v32  ;;  %v1441_v26 = vmul.f32 %v1440_v11, %v3971_v52 }
 0x60a   : > { %v1452_v60 = vmul.f32 %v1451_v56, %v3971_v52  ;;  %v1388_v56 = vmul.f32 0.5, %v3957_v49 }
 0x60b   : > { %v1413_v3 = vadd.f32 1.0, %v1412_v59  ;;  %v1402_v35 = vadd.f32 1.1283791, %v1401_v17  ;;  %v1442_v58 = vadd.f32 1.1283791, %v1441_v26 }
 0x60c   : > { %v1453_v47 = vadd.f32 1.0, %v1452_v60  ;;  %1697 = vmatpush.bf16.msra.mxu0 %v3817_v45 }
 0x60d   : > { %3400 = vrcp.f32 %v1413_v3  ;;  %v1425_v40 = vand.u32 2147483648, %v1413_v3  ;;  %v1423_v14 = vand.u32 2147483647, %v1413_v3  ;;  %vm1419_vm11 = vweird.f32 %v1413_v3 }
 0x60e   : > { %3402 = vrcp.f32 %v1453_v47  ;;  %v1465_v2 = vand.u32 2147483648, %v1453_v47  ;;  %v1463_v46 = vand.u32 2147483647, %v1453_v47  ;;  %vm1459_vm13 = vweird.f32 %v1453_v47 }
 0x60f   : > { %v1426_v52 = vor.u32 1.1754944e-38, %v1425_v40  ;;  %v1403_v38 = vmul.f32 %v1402_v35, %v3960_v29  ;;  %vm1424_vm14 = vcmp.eq.f32.partialorder %v1423_v14, 8.507059e+37  ;;  %v1443_v27 = vmul.f32 %v1442_v58, %v3963_v36  ;;  %v3371_v58 = vld [vmem:[%s4218_s13] ss:$0 sm:$0xff] }
 0x610   : > { %v1466_v18 = vor.u32 1.1754944e-38, %v1465_v2  ;;  %vm1464_vm5 = vcmp.eq.f32.partialorder %v1463_v46, 8.507059e+37  ;;  %1698 = vmatpush.bf16.msra.mxu0 %v3822_v57  ;;  %v1387_v29 = vmul.f32 0.5, %v3955_v19  ;;  %v3369_v57 = vld [vmem:[%s4214_s9] ss:$0 sm:$0xff] }
 0x613   : > { %v3401_v16 = vpop.eup %3400 }
 0x614   : > { %v3403_v25 = vpop.eup %3402  ;;  %v1415_v23 = vmul.f32 %v3401_v16, %v1413_v3  ;;  %vm1420_vm9 = vweird.f32 %v3401_v16  ;;  %1699 = vmatpush.bf16.msra.mxu0 %v3826_v63 }
 0x615   : > { %v1455_v30 = vmul.f32 %v3403_v25, %v1453_v47  ;;  %vm1460_vm10 = vweird.f32 %v3403_v25  ;;  %vm1421_vm12 = vmor %vm1419_vm11, %vm1420_vm9 }
 0x616   : > { %v1416_v31 = vsub.f32 1.0, %v1415_v23  ;;  %vm1461_vm15 = vmor %vm1459_vm13, %vm1460_vm10 }
 0x617   : > { %v1456_v41 = vsub.f32 1.0, %v1455_v30 }
 0x618   : > { %v1417_v28 = vmul.f32 %v3401_v16, %v1416_v31  ;;  %1700 = vmatpush.bf16.msra.mxu0 %v3829_v1 }
 0x619   : > { %v1457_v33 = vmul.f32 %v3403_v25, %v1456_v41 }
 0x61a   : > { %v1418_v32 = vadd.f32 %v3401_v16, %v1417_v28  ;;  %v3370_v28 = vld [vmem:[%s4217_s12] ss:$0 sm:$0xff] }
 0x61b   : > { %v1458_v15 = vadd.f32 %v3403_v25, %v1457_v33 }
 0x61c   : > { %v1422_v48 = vsel %vm1421_vm12, %v3401_v16, %v1418_v32 }
 0x61d   : > { %v1427_v22 = vsel %vm1424_vm14, %v1426_v52, %v1422_v48  ;;  %v1462_v37 = vsel %vm1461_vm15, %v3403_v25, %v1458_v15 }
 0x61e   : > { %v1428_v45 = vmul.f32 %v1427_v22, %v1403_v38  ;;  %v1467_v42 = vsel %vm1464_vm5, %v1466_v18, %v1462_v37 }
 0x61f   : > { %v1468_v43 = vmul.f32 %v1467_v42, %v1443_v27 }
 0x620   : > { %v2945_v44 = vclamps-f32 %v1428_v45, 1.0 }
 0x621   : > { %v2946_v53 = vclamps-f32 %v1468_v43, 1.0 }
 0x622   : > { %v1471_v55 = vadd.f32 1.0, %v2945_v44 }
 0x623   : > { %v1472_v59 = vadd.f32 1.0, %v2946_v53 }
 0x624   : > { %v1473_v20 = vmul.f32 %v1471_v55, %v1387_v29 }
 0x625   : > { %v1474_v60 = vmul.f32 %v1472_v59, %v1388_v56 }
 0x626   : > { %v1475_v36 = vpack.c.bf16 %v1473_v20, %v1473_v20 }
 0x627   : > { %v1476_v61 = vpack.c.bf16 %v1474_v60, %v1474_v60 }
 0x628   : > { %1617 = vmatmul.bf16.vlgmr.msrb.gmra.mxu0 %v1475_v36 }
 0x629   : > { %1630 = vmatmul.bf16.vlgmr.msrb.gmra.mxu1 %v1476_v61 }
 0x6a5   : > { %v1618_v3 = vpop.f32.mrf.mxu0 }
 0x6a6   : > { %v1619_v63 = vadd.f32 %v3369_v57, %v1618_v3  ;;  %v1631_v47 = vpop.f32.mrf.mxu1 }
 0x6a8   : > { %v1632_v19 = vadd.f32 %v1631_v47, %v1619_v63 }
 0x6aa   : > { %v1635_v7 = vadd.f32 %v1632_v19, %v3948_v34 }
 0x6ac   : > { %1638 = vadd.xlane.f32.xlu0 %v1635_v7 }
 0x6ad   : > { %v1620_v49 = vpop.f32.mrf.mxu0 }
 0x6ae   : > { %v1633_v10 = vpop.f32.mrf.mxu1 }
 0x6af   : > { %v3436_v10 = vld [vmem:[%s3729_s19] ss:$0 sm:$0xff] }
 0x71f   : > { %v1639_v11 = vpop.xlane.xlu0 %1638 }
 0x720   : > { %v1640_v1 = vmul.f32 %v1639_v11, %v3917_v62 }
 0x722   : > { %v1641_v16 = vsub.f32 %v1635_v7, %v1640_v1 }
 0x724   : > { %v1642_v17 = vmul.f32 %v1641_v16, %v1641_v16 }
 0x726   : > { %1643 = vadd.xlane.f32.xlu0 %v1642_v17 }
 0x799   : > { %v1644_v25 = vpop.xlane.xlu0 %1643 }
 0x79a   : > { %v1645_v23 = vmul.f32 %v1644_v25, %v3917_v62 }
 0x79c   : > { %v1646_v26 = vadd.f32 1e-05, %v1645_v23 }
 0x79e   : > { %3404 = vrsqrt.f32 %v1646_v26  ;;  %vm1653_vm7 = vweird.f32 %v1646_v26 }
 0x7a4   : > { %v3405_v30 = vpop.eup %3404 }
 0x7a5   : > { %v1648_v31 = vmul.f32 %v3405_v30, %v1646_v26  ;;  %vm1654_vm6 = vweird.f32 %v3405_v30 }
 0x7a6   : > { %vm1655_vm8 = vmor %vm1653_vm7, %vm1654_vm6 }
 0x7a7   : > { %v1649_v35 = vmul.f32 %v3405_v30, %v1648_v31 }
 0x7a9   : > { %v1650_v40 = vmul.f32 0.5, %v1649_v35 }
 0x7ab   : > { %v1651_v41 = vsub.f32 1.5, %v1650_v40 }
 0x7ad   : > { %v1652_v34 = vmul.f32 %v3405_v30, %v1651_v41 }
 0x7af   : > { %v1656_v14 = vsel %vm1655_vm8, %v3405_v30, %v1652_v34 }
 0x7b0   : > { %v1657_v2 = vmul.f32 %v1656_v14, %v1641_v16 }
 0x7b2   : > { %v1661_v33 = vmul.f32 %v3370_v28, %v1657_v2 }
 0x7b4   : > { %v4017_v46 = vadd.f32 %v3371_v58, %v1661_v33 }
 0x7b6   : > { %v1666_v32 = vpack.c.bf16 %v4017_v46, %v4017_v46 }
 0x7b8   : > { %1675 = vmatmul.bf16.vlgmr.msrb.gmra.mxu2 %v1666_v32  ;;  %1688 = vmatmul.bf16.vlgmr.msrb.gmra.mxu3 %v1666_v32 }
 0x7b9   : > { %1701 = vmatmul.bf16.vlgmr.msra.gmra.mxu0 %v1666_v32 }
 0x836   : > { %v1702_v52 = vpop.f32.mrf.mxu0 }
 0x837   : > { %v4023_v15 = vadd.f32 %v1702_v52, %v722_v21 }
 0x839   : > { %v1744_v27 = vpack.c.bf16 %v4023_v15, %v4023_v15 }
 0x83b   : > { %v1676_v38 = vpop.f32.mrf.mxu2  ;;  %v1689_v48 = vpop.f32.mrf.mxu3  ;;  %v1876_v42 = vsel %vm1064_vm2, %v1744_v27, 0 }
 0x83c   : > { %v1677_v18 = vadd.f32 %v1676_v38, %v720_v54  ;;  %v1690_v22 = vadd.f32 %v1689_v48, %v721_v51 }
 0x83e   : > { %v1704_v37 = vpop.f32.mrf.mxu0  ;;  %1724 = vrot.lane.b32.xlu2 %v1690_v22, %s3553_s20  ;;  %1721 = vrot.lane.b32.xlu0 %v1690_v22, %s3554_s2  ;;  %v1730_v45 = vpack.c.bf16 %v1690_v22, %v1690_v22  ;;  %v1716_v51 = vpack.c.bf16 %v1677_v18, %v1677_v18 }
 0x83f   : > { %1707 = vrot.lane.b32.xlu1 %v1677_v18, %s3554_s2 }
 0x840   : > { %v1752_v21 = vsel %vm935_vm0, %v1730_v45, 0 }
 0x841   : > { %1761 = vmatpush.bf16.xpose.msra.mxu1 %v1752_v21 }
 0x843   : > { %v1678_v54 = vpop.f32.mrf.mxu2  ;;  %v1691_v50 = vpop.f32.mrf.mxu3 }
 0x846   : > { %1727 = vrot.lane.b32.xlu2 %v1690_v22, %s3552_s30  ;;  %1710 = vrot.lane.b32.xlu0 %v1677_v18, %s3553_s20 }
 0x848   : > { %3011 = vmatmul.msk.bf16.vlgmr.msra.gmra.mxu1 %vm935_vm0, %v1716_v51 }
 0x849   : > { %1885 = vmatpush.bf16.msrb.mxu1 %v1876_v42 }
 0x84d   : > { %1964 = vmatpush.bf16.msra.mxu1 %v3862_v0 }
 0x84e   : > { %1713 = vrot.lane.b32.xlu0 %v1677_v18, %s3552_s30 }
 0x851   : > { %1965 = vmatpush.bf16.msra.mxu1 %v3868_v4 }
 0x855   : > { %1966 = vmatpush.bf16.msra.mxu1 %v3874_v5 }
 0x859   : > { %1967 = vmatpush.bf16.msra.mxu1 %v3880_v6 }
 0x85d   : > { %1968 = vmatpush.bf16.msra.mxu1 %v3886_v8 }
 0x861   : > { %1969 = vmatpush.bf16.msra.mxu1 %v3892_v9 }
 0x865   : > { %1970 = vmatpush.bf16.msra.mxu1 %v3898_v12 }
 0x869   : > { %1971 = vmatpush.bf16.msra.mxu1 %v3904_v13 }
 0x898   : > { %v1725_v43 = vpop.permute.xlu2 %1724 }
 0x899   : > { %v1732_v44 = vpack.c.bf16 %v1725_v43, %v1725_v43 }
 0x89b   : > { %v1790_v0 = vsel %vm935_vm0, %v1732_v44, 0 }
 0x89c   : > { %1799 = vmatpush.bf16.xpose.msra.mxu3 %v1790_v0 }
 0x8a0   : > { %v1728_v4 = vpop.permute.xlu2 %1727 }
 0x8a1   : > { %v1733_v53 = vpack.c.bf16 %v1728_v4, %v1728_v4 }
 0x8a3   : > { %v1809_v29 = vsel %vm935_vm0, %v1733_v53, 0 }
 0x8a4   : > { %1818 = vmatpush.bf16.xpose.msrb.mxu0 %v1809_v29 }
 0x8b0   : > { %v1722_v5 = vpop.permute.xlu0 %1721 }
 0x8b1   : > { %v1731_v6 = vpack.c.bf16 %v1722_v5, %v1722_v5  ;;  %v1708_v9 = vpop.permute.xlu1 %1707 }
 0x8b2   : > { %v1717_v12 = vpack.c.bf16 %v1708_v9, %v1708_v9 }
 0x8b3   : > { %v1771_v8 = vsel %vm935_vm0, %v1731_v6, 0 }
 0x8b4   : > { %1780 = vmatpush.bf16.xpose.msra.mxu2 %v1771_v8 }
 0x8b8   : > { %v1711_v55 = vpop.permute.xlu0 %1710 }
 0x8b9   : > { %v1718_v56 = vpack.c.bf16 %v1711_v55, %v1711_v55 }
 0x8bb   : > { %3012 = vmatmul.msk.bf16.vlgmr.msra.gmra.mxu2 %vm935_vm0, %v1717_v12  ;;  %3013 = vmatmul.msk.bf16.vlgmr.msra.gmra.mxu3 %vm935_vm0, %v1718_v56 }
 0x8c0   : > { %v1714_v13 = vpop.permute.xlu0 %1713 }
 0x8c1   : > { %v1719_v59 = vpack.c.bf16 %v1714_v13, %v1714_v13 }
 0x8c3   : > { %3014 = vmatmul.msk.bf16.vlgmr.msrb.gmra.mxu0 %vm935_vm0, %v1719_v59 }
 0x8c5   : > { %v1763_v20 = vpop.f32.mrf.mxu1 }
 0x8c6   : > { %v1764_v11 = vadd.f32 %v3436_v10, %v1763_v20 }
 0x8c8   : > { %v1824_v25 = vsel %vm1012_vm1, %v1764_v11, -inf }
 0x8cd   : > { %v1765_v60 = vpop.f32.mrf.mxu1 }
 0x93e   : > { %v1782_v36 = vpop.f32.mrf.mxu2  ;;  %v1801_v61 = vpop.f32.mrf.mxu3 }
 0x93f   : > { %v1783_v57 = vadd.f32 %v3815_v39, %v1782_v36  ;;  %v1802_v3 = vadd.f32 %v3815_v39, %v1801_v61 }
 0x940   : > { %v1820_v63 = vpop.f32.mrf.mxu0 }
 0x941   : > { %v1821_v47 = vadd.f32 %v3815_v39, %v1820_v63  ;;  %v1830_v19 = vsel %vm1012_vm1, %v1802_v3, -inf  ;;  %v1827_v7 = vsel %vm1012_vm1, %v1783_v57, -inf }
 0x942   : > { %1831 = vmax.xlane.f32.xlu2 %v1830_v19  ;;  %1828 = vmax.xlane.f32.xlu1 %v1827_v7 }
 0x943   : > { %v1833_v49 = vsel %vm1012_vm1, %v1821_v47, -inf }
 0x944   : > { %1834 = vmax.xlane.f32.xlu0 %v1833_v49 }
 0x946   : > { %v1784_v1 = vpop.f32.mrf.mxu2  ;;  %v1803_v16 = vpop.f32.mrf.mxu3 }
 0x948   : > { %v1822_v17 = vpop.f32.mrf.mxu0 }
 0x94a   : > { %1825 = vmax.xlane.f32.xlu1 %v1824_v25 }
 0x963   : > { %1735 = vrot.lane.b32.xlu1 %v4023_v15, %s3554_s2 }
 0x9b5   : > { %v1829_v39 = vpop.xlane.xlu1 %1828  ;;  %v1832_v23 = vpop.xlane.xlu2 %1831 }
 0x9b6   : > { %v1837_v26 = vsub.f32 %v1783_v57, %v1829_v39  ;;  %v1838_v40 = vsub.f32 %v1802_v3, %v1832_v23 }
 0x9b7   : > { %v1835_v30 = vpop.xlane.xlu0 %1834 }
 0x9b8   : > { %v1842_v31 = vmul.f32 1.442695, %v1837_v26  ;;  %v1839_v35 = vsub.f32 %v1821_v47, %v1835_v30  ;;  %v1844_v34 = vmul.f32 1.442695, %v1838_v40  ;;  %v3080_v30 = vld [vmem:[#allocation4 + $0xf0] sm:$0xf] }
 0x9ba   : > { %v1846_v41 = vmul.f32 1.442695, %v1839_v35  ;;  %3406 = vpow2.f32 %v1842_v31  ;;  %v3286_v31 = vld [vmem:[#allocation4 + $0xf4] sm:$0xf0]  ;;  %v3285_v35 = vld [vmem:[#allocation4 + $0xf4] sm:$0xf] }
 0x9bb   : > { %v3081_v40 = vor.u32 %v3286_v31, %v3080_v30  ;;  %v3373_v31 = vld [vmem:[%s4216_s11 + $0x1] ss:$0 sm:$0xff] }
 0x9bc   : > { %3408 = vpow2.f32 %v1846_v41  ;;  %v3082_v41 = vld [vmem:[#allocation4 + $0xf8] sm:$0xf0] }
 0x9bd   : > { %v1826_v28 = vpop.xlane.xlu1 %1825  ;;  %3410 = vpow2.f32 %v1844_v34  ;;  %v3085_v34 = vor.u32 %v3285_v35, %v3082_v41 }
 0x9be   : > { %v1836_v14 = vsub.f32 %v1764_v11, %v1826_v28 }
 0x9c0   : > { %v1840_v2 = vmul.f32 1.442695, %v1836_v14  ;;  %v3407_v58 = vpop.eup %3406 }
 0x9c1   : > { %v1851_v32 = vsel %vm1012_vm1, %v3407_v58, 0.0 }
 0x9c2   : > { %v3409_v33 = vpop.eup %3408  ;;  %3412 = vpow2.f32 %v1840_v2  ;;  %1852 = vadd.xlane.f32.xlu2 %v1851_v32 }
 0x9c3   : > { %v1857_v52 = vsel %vm1012_vm1, %v3409_v33, 0.0  ;;  %v3411_v38 = vpop.eup %3410 }
 0x9c4   : > { %1858 = vadd.xlane.f32.xlu0 %v1857_v52  ;;  %v1854_v22 = vsel %vm1012_vm1, %v3411_v38, 0.0  ;;  %v3074_v52 = vld [vmem:[#allocation4 + $0xe8] sm:$0xf0] }
 0x9c8   : > { %v3413_v48 = vpop.eup %3412 }
 0x9c9   : > { %v1848_v18 = vsel %vm1012_vm1, %v3413_v48, 0.0 }
 0x9ca   : > { %1849 = vadd.xlane.f32.xlu1 %v1848_v18  ;;  %v3282_v18 = vld [vmem:[#allocation4 + $0xd4] sm:$0xf0] }
 0x9cc   : > { %1855 = vadd.xlane.f32.xlu0 %v1854_v22  ;;  %v3281_v22 = vld [vmem:[#allocation4 + $0xd4] sm:$0xf] }
 0x9d5   : > { %v1736_v27 = vpop.permute.xlu1 %1735 }
 0x9d6   : > { %v1745_v37 = vpack.c.bf16 %v1736_v27, %v1736_v27 }
 0x9d8   : > { %v1895_v45 = vsel %vm1064_vm2, %v1745_v37, 0  ;;  %v3066_v37 = vld [vmem:[#allocation4 + $0xd8] sm:$0xf0] }
 0x9d9   : > { %1904 = vmatpush.bf16.msrb.mxu2 %v1895_v45  ;;  %v3069_v45 = vor.u32 %v3281_v22, %v3066_v37 }
 0x9da   : > { %1738 = vrot.lane.b32.xlu2 %v4023_v15, %s3553_s20 }
 0x9dd   : > { %2115 = vmatpush.bf16.msra.mxu2 %v3081_v40 }
 0x9e0   : > { %1741 = vrot.lane.b32.xlu0 %v4023_v15, %s3552_s30 }
 0xa35   : > { %v1853_v21 = vpop.xlane.xlu2 %1852 }
 0xa36   : > { %3414 = vrcp.f32 %v1853_v21  ;;  %v3056_v21 = vld [vmem:[#allocation4 + $0xc0] sm:$0xf] }
 0xa37   : > { %v1859_v42 = vpop.xlane.xlu0 %1858 }
 0xa3c   : > { %v3415_v54 = vpop.eup %3414 }
 0xa3d   : > { %v1850_v50 = vpop.xlane.xlu1 %1849  ;;  %v1865_v51 = vmul.f32 %v3415_v54, %v3407_v58  ;;  %v1739_v43 = vpop.permute.xlu2 %1738  ;;  %v3284_v58 = vld [vmem:[#allocation4 + $0xe4] sm:$0xf0]  ;;  %v3279_v54 = vld [vmem:[#allocation4 + $0xc4] sm:$0xf] }
 0xa3e   : > { %3416 = vrcp.f32 %v1850_v50  ;;  %v1746_v44 = vpack.c.bf16 %v1739_v43, %v1739_v43 }
 0xa3f   : > { %v1856_v0 = vpop.xlane.xlu0 %1855  ;;  %v1869_v4 = vpack.c.bf16 %v1865_v51, %v1865_v51  ;;  %v3058_v51 = vld [vmem:[#allocation4 + $0xc8] sm:$0xf0] }
 0xa40   : > { %3418 = vrcp.f32 %v1856_v0  ;;  %v1914_v53 = vsel %vm1064_vm2, %v1746_v44, 0  ;;  %v3061_v43 = vor.u32 %v3279_v54, %v3058_v51  ;;  %v3048_v44 = vld [vmem:[#allocation4 + $0xb0] sm:$0xf]  ;;  %v3278_v0 = vld [vmem:[#allocation4 + $0xb4] sm:$0xf0] }
 0xa41   : > { %3016 = vmatmul.msk.bf16.vlgmr.msrb.gmra.mxu2 %vm1012_vm1, %v1869_v4  ;;  %1923 = vmatpush.bf16.msrb.mxu3 %v1914_v53  ;;  %3420 = vrcp.f32 %v1859_v42  ;;  %v3280_v42 = vld [vmem:[#allocation4 + $0xc4] sm:$0xf0]  ;;  %v3277_v4 = vld [vmem:[#allocation4 + $0xb4] sm:$0xf]  ;;  %v3049_v53 = vor.u32 %v3278_v0, %v3048_v44 }
 0xa42   : > { %v3057_v50 = vor.u32 %v3280_v42, %v3056_v21  ;;  %v3291_v21 = vld [vmem:[#allocation6 + $0xa0] sm:$0xff] }
 0xa43   : > { %v3299_v42 = vld [vmem:[#allocation6 + $0xe0] sm:$0xff] }
 0xa44   : > { %v3417_v29 = vpop.eup %3416 }
 0xa45   : > { %v1864_v5 = vmul.f32 %v3417_v29, %v3413_v48  ;;  %2128 = vmatpush.bf16.msra.mxu3 %v3085_v34  ;;  %v3064_v48 = vld [vmem:[#allocation4 + $0xd0] sm:$0xf]  ;;  %v3050_v29 = vld [vmem:[#allocation4 + $0xb8] sm:$0xf0] }
 0xa46   : > { %v3419_v15 = vpop.eup %3418  ;;  %v3065_v27 = vor.u32 %v3282_v18, %v3064_v48  ;;  %v3294_v34 = vld [vmem:[#allocation6 + $0xb8] sm:$0xff]  ;;  %v3292_v48 = vld [vmem:[#allocation6 + $0xa8] sm:$0xff] }
 0xa47   : > { %v1868_v6 = vpack.c.bf16 %v1864_v5, %v1864_v5  ;;  %v1866_v8 = vmul.f32 %v3419_v15, %v3411_v38  ;;  %v3421_v55 = vpop.eup %3420  ;;  %v3053_v5 = vor.u32 %v3277_v4, %v3050_v29  ;;  %v3040_v15 = vld [vmem:[#allocation4 + $0xa0] sm:$0xf]  ;;  %v3300_v18 = vld [vmem:[#allocation6 + $0xe8] sm:$0xff]  ;;  %v3290_v29 = vld [vmem:[#allocation6 + $0x98] sm:$0xff] }
 0xa48   : > { %v1867_v56 = vmul.f32 %v3421_v55, %v3409_v33  ;;  %v3283_v33 = vld [vmem:[#allocation4 + $0xe4] sm:$0xf]  ;;  %v3042_v55 = vld [vmem:[#allocation4 + $0xa8] sm:$0xf0] }
 0xa49   : > { %v1870_v9 = vpack.c.bf16 %v1866_v8, %v1866_v8  ;;  %3015 = vmatmul.msk.bf16.vlgmr.msrb.gmra.mxu1 %vm1012_vm1, %v1868_v6  ;;  %v3077_v38 = vor.u32 %v3283_v33, %v3074_v52  ;;  %v3276_v6 = vld [vmem:[#allocation4 + $0xa4] sm:$0xf0]  ;;  %v3275_v8 = vld [vmem:[#allocation4 + $0xa4] sm:$0xf] }
 0xa4a   : > { %v1871_v20 = vpack.c.bf16 %v1867_v56, %v1867_v56  ;;  %v3032_v56 = vld [vmem:[#allocation4 + $0x90] sm:$0xf] }
 0xa4b   : > { %3017 = vmatmul.msk.bf16.vlgmr.msrb.gmra.mxu3 %vm1012_vm1, %v1870_v9  ;;  %v3041_v9 = vor.u32 %v3276_v6, %v3040_v15 }
 0xa4c   : > { %2129 = vmatpush.bf16.msra.mxu3 %v3077_v38 }
 0xa50   : > { %2130 = vmatpush.bf16.msra.mxu3 %v3069_v45 }
 0xa52   : > { %v1742_v12 = vpop.permute.xlu0 %1741 }
 0xa53   : > { %v1747_v13 = vpack.c.bf16 %v1742_v12, %v1742_v12  ;;  %v3045_v12 = vor.u32 %v3275_v8, %v3042_v55 }
 0xa54   : > { %2131 = vmatpush.bf16.msra.mxu3 %v3061_v43 }
 0xa55   : > { %v1933_v59 = vsel %vm1064_vm2, %v1747_v13, 0  ;;  %v3274_v13 = vld [vmem:[#allocation4 + $0x94] sm:$0xf0] }
 0xa56   : > { %1942 = vmatpush.bf16.msra.mxu0 %v1933_v59  ;;  %v3273_v59 = vld [vmem:[#allocation4 + $0x94] sm:$0xf] }
 0xa58   : > { %2132 = vmatpush.bf16.msra.mxu3 %v3053_v5  ;;  %v3298_v5 = vld [vmem:[#allocation6 + $0xd8] sm:$0xff] }
 0xa59   : > { %3018 = vmatmul.msk.bf16.vlgmr.msra.gmra.mxu0 %vm1012_vm1, %v1871_v20  ;;  %v3033_v20 = vor.u32 %v3274_v13, %v3032_v56  ;;  %v3289_v13 = vld [vmem:[#allocation6 + $0x90] sm:$0xff] }
 0xa5a   : > { %2365 = vmatpush.bf16.msrb.mxu0 %v3294_v34 }
 0xa5c   : > { %2133 = vmatpush.bf16.msra.mxu3 %v3045_v12 }
 0xac4   : > { %v1906_v60 = vpop.f32.mrf.mxu2 }
 0xac5   : > { %1949 = vrot.lane.b32.xlu2 %v1906_v60, %s3552_s30  ;;  %v3034_v60 = vld [vmem:[#allocation4 + $0x98] sm:$0xf0] }
 0xac6   : > { %v1887_v36 = vpop.f32.mrf.mxu1 }
 0xacc   : > { %v1908_v61 = vpop.f32.mrf.mxu2 }
 0xacd   : > { %v3272_v61 = vld [vmem:[#allocation4 + $0x84] sm:$0xf0] }
 0xace   : > { %v1889_v57 = vpop.f32.mrf.mxu1  ;;  %v1925_v3 = vpop.f32.mrf.mxu3 }
 0xacf   : > { %1953 = vrot.lane.b32.xlu0 %v1925_v3, %s3553_s20  ;;  %v3037_v57 = vor.u32 %v3273_v59, %v3034_v60  ;;  %v3271_v3 = vld [vmem:[#allocation4 + $0x84] sm:$0xf]  ;;  %v3297_v59 = vld [vmem:[#allocation6 + $0xd0] sm:$0xff] }
 0xad1   : > { %2134 = vmatpush.bf16.msra.mxu3 %v3037_v57 }
 0xad6   : > { %v1927_v63 = vpop.f32.mrf.mxu3  ;;  %v1944_v47 = vpop.f32.mrf.mxu0 }
 0xad7   : > { %1957 = vrot.lane.b32.xlu2 %v1944_v47, %s3554_s2  ;;  %v3026_v63 = vld [vmem:[#allocation4 + $0x88] sm:$0xf0] }
 0xade   : > { %v1946_v19 = vpop.f32.mrf.mxu0 }
 0xadf   : > { %v3029_v19 = vor.u32 %v3271_v3, %v3026_v63  ;;  %v3288_v63 = vld [vmem:[#allocation6 + $0x88] sm:$0xff] }
 0xae1   : > { %2135 = vmatpush.bf16.msra.mxu3 %v3029_v19 }
 0xb1f   : > { %v1950_v7 = vpop.permute.xlu2 %1949 }
 0xb20   : > { %v1960_v49 = vsel %vm935_vm0, %v1887_v36, %v1950_v7  ;;  %v3024_v36 = vld [vmem:[#allocation4 + $0x80] sm:$0xf] }
 0xb21   : > { %v3025_v47 = vor.u32 %v3272_v61, %v3024_v36 }
 0xb31   : > { %v1958_v11 = vpop.permute.xlu2 %1957 }
 0xb41   : > { %v1954_v10 = vpop.permute.xlu0 %1953 }
 0xb42   : > { %v1961_v1 = vsel %vm1151_vm3, %v1960_v49, %v1954_v10 }
 0xb43   : > { %v1962_v16 = vsel %vm1153_vm4, %v1961_v1, %v1958_v11 }
 0xb44   : > { %v1963_v17 = vpack.c.bf16 %v1962_v16, %v1962_v16 }
 0xb46   : > { %1972 = vmatmul.bf16.vlgmr.msra.gmra.mxu1 %v1963_v17 }
 0xbc3   : > { %v1973_v25 = vpop.f32.mrf.mxu1 }
 0xbc4   : > { %v1974_v39 = vadd.f32 %v3913_v24, %v1973_v25 }
 0xbc6   : > { %v1977_v23 = vadd.f32 %v1974_v39, %v4017_v46  ;;  %v3072_v46 = vld [vmem:[#allocation4 + $0xe0] sm:$0xf] }
 0xbc7   : > { %v3073_v32 = vor.u32 %v3284_v58, %v3072_v46  ;;  %v3293_v46 = vld [vmem:[#allocation6 + $0xb0] sm:$0xff] }
 0xbc8   : > { %1982 = vadd.xlane.f32.xlu0 %v1977_v23  ;;  %v3301_v58 = vld [vmem:[#allocation6 + $0xf0] sm:$0xff]  ;;  %2366 = vmatpush.bf16.msrb.mxu0 %v3293_v46 }
 0xbc9   : > { %2116 = vmatpush.bf16.msra.mxu2 %v3073_v32 }
 0xbcb   : > { %v1975_v26 = vpop.f32.mrf.mxu1 }
 0xbcc   : > { %2367 = vmatpush.bf16.msrb.mxu0 %v3292_v48 }
 0xbcd   : > { %2117 = vmatpush.bf16.msra.mxu2 %v3065_v27 }
 0xbd0   : > { %2368 = vmatpush.bf16.msrb.mxu0 %v3291_v21 }
 0xbd1   : > { %2118 = vmatpush.bf16.msra.mxu2 %v3057_v50 }
 0xbd4   : > { %2369 = vmatpush.bf16.msrb.mxu0 %v3290_v29 }
 0xbd5   : > { %2119 = vmatpush.bf16.msra.mxu2 %v3049_v53 }
 0xbd8   : > { %2370 = vmatpush.bf16.msrb.mxu0 %v3289_v13 }
 0xbd9   : > { %2120 = vmatpush.bf16.msra.mxu2 %v3041_v9 }
 0xbdc   : > { %2371 = vmatpush.bf16.msrb.mxu0 %v3288_v63 }
 0xbdd   : > { %2121 = vmatpush.bf16.msra.mxu2 %v3033_v20 }
 0xbe1   : > { %2122 = vmatpush.bf16.msra.mxu2 %v3025_v47  ;;  %v3296_v47 = vld [vmem:[#allocation6 + $0xc8] sm:$0xff] }
 0xc3b   : > { %v1983_v28 = vpop.xlane.xlu0 %1982 }
 0xc3c   : > { %v1984_v14 = vmul.f32 %v1983_v28, %v3917_v62  ;;  %v3302_v28 = vld [vmem:[#allocation6 + $0xf8] sm:$0xff] }
 0xc3d   : > { %2378 = vmatpush.bf16.msrb.mxu1 %v3302_v28 }
 0xc3e   : > { %v4088_v2 = vsub.f32 %v1977_v23, %v1984_v14  ;;  %v3372_v23 = vld [vmem:[%s4215_s10 + $0x1] ss:$0 sm:$0xff]  ;;  %v3021_v14 = vld [vmem:[%s4212_s7 + $0x2] sm:$0x3] }
 0xc40   : > { %v1986_v24 = vmul.f32 %v4088_v2, %v4088_v2 }
 0xc41   : > { %2379 = vmatpush.bf16.msrb.mxu1 %v3301_v58 }
 0xc42   : > { %1987 = vadd.xlane.f32.xlu2 %v1986_v24  ;;  %v2032_v24 = vperm.slane %v3021_v14, 1 }
 0xc45   : > { %2380 = vmatpush.bf16.msrb.mxu1 %v3300_v18 }
 0xc49   : > { %2381 = vmatpush.bf16.msrb.mxu1 %v3299_v42 }
 0xc4d   : > { %2382 = vmatpush.bf16.msrb.mxu1 %v3298_v5 }
 0xc51   : > { %2383 = vmatpush.bf16.msrb.mxu1 %v3297_v59 }
 0xc55   : > { %2384 = vmatpush.bf16.msrb.mxu1 %v3296_v47 }
 0xcb5   : > { %v1988_v7 = vpop.xlane.xlu2 %1987 }
 0xcb6   : > { %v1989_v49 = vmul.f32 %v1988_v7, %v3917_v62 }
 0xcb8   : > { %v1990_v10 = vadd.f32 1e-05, %v1989_v49 }
 0xcba   : > { %3422 = vrsqrt.f32 %v1990_v10  ;;  %vm1997_vm1 = vweird.f32 %v1990_v10 }
 0xcc0   : > { %v3423_v11 = vpop.eup %3422 }
 0xcc1   : > { %v1992_v1 = vmul.f32 %v3423_v11, %v1990_v10  ;;  %vm1998_vm0 = vweird.f32 %v3423_v11 }
 0xcc2   : > { %vm1999_vm2 = vmor %vm1997_vm1, %vm1998_vm0 }
 0xcc3   : > { %v1993_v16 = vmul.f32 %v3423_v11, %v1992_v1 }
 0xcc5   : > { %v1994_v17 = vmul.f32 0.5, %v1993_v16  ;;  %v3287_v16 = vld [vmem:[#allocation6 + $0x80] sm:$0xff] }
 0xcc6   : > { %2372 = vmatpush.bf16.msrb.mxu0 %v3287_v16 }
 0xcc7   : > { %v1995_v25 = vsub.f32 1.5, %v1994_v17  ;;  %v3295_v17 = vld [vmem:[#allocation6 + $0xc0] sm:$0xff] }
 0xcc8   : > { %2385 = vmatpush.bf16.msrb.mxu1 %v3295_v17 }
 0xcc9   : > { %v1996_v39 = vmul.f32 %v3423_v11, %v1995_v25 }
 0xccb   : > { %v2000_v26 = vsel %vm1999_vm2, %v3423_v11, %v1996_v39 }
 0xccc   : > { %v2001_v30 = vmul.f32 %v2000_v26, %v4088_v2  ;;  %v2031_v2 = vperm.slane %v3021_v14, 0 }
 0xcce   : > { %v2005_v35 = vmul.f32 %v3372_v23, %v2001_v30 }
 0xcd0   : > { %v4100_v40 = vadd.f32 %v3373_v31, %v2005_v35 }
 0xcd2   : > { %v2010_v41 = vpack.c.bf16 %v4100_v40, %v4100_v40 }
 0xcd4   : > { %2123 = vmatmul.bf16.vlgmr.msra.gmra.mxu2 %v2010_v41  ;;  %2136 = vmatmul.bf16.vlgmr.msra.gmra.mxu3 %v2010_v41 }
 0xd57   : > { %v2124_v33 = vpop.f32.mrf.mxu2  ;;  %v2137_v32 = vpop.f32.mrf.mxu3 }
 0xd58   : > { %v4107_v52 = vadd.f32 %v2124_v33, %v2031_v2  ;;  %v4109_v38 = vadd.f32 %v2137_v32, %v2032_v24 }
 0xd5a   : > { %v4112_v22 = vmul.f32 0.70710677, %v4107_v52  ;;  %v4115_v27 = vmul.f32 0.70710677, %v4109_v38 }
 0xd5c   : > { %v2145_v37 = vmul.f32 %v4112_v22, %v4112_v22  ;;  %v2185_v45 = vmul.f32 %v4115_v27, %v4115_v27 }
 0xd5e   : > { %v2146_v54 = vmin.f32 %v2145_v37, 16.0  ;;  %v4121_v50 = vmin.f32 %v2185_v45, 16.0 }
 0xd5f   : > { %v2126_v51 = vpop.f32.mrf.mxu2  ;;  %v2139_v43 = vpop.f32.mrf.mxu3 }
 0xd60   : > { %v2147_v44 = vmul.f32 2.1237322e-06, %v2146_v54  ;;  %v2158_v0 = vmul.f32 3.8918573e-05, %v2146_v54  ;;  %v2187_v4 = vmul.f32 2.1237322e-06, %v4121_v50 }
 0xd61   : > { %v2198_v53 = vmul.f32 3.8918573e-05, %v4121_v50 }
 0xd62   : > { %v2148_v15 = vadd.f32 0.00028619796, %v2147_v44  ;;  %v2159_v6 = vadd.f32 0.001143296, %v2158_v0  ;;  %v2188_v8 = vadd.f32 0.00028619796, %v2187_v4 }
 0xd63   : > { %v2199_v9 = vadd.f32 0.001143296, %v2198_v53 }
 0xd64   : > { %v2149_v55 = vmul.f32 %v2148_v15, %v2146_v54  ;;  %v2160_v12 = vmul.f32 %v2159_v6, %v2146_v54  ;;  %v2189_v56 = vmul.f32 %v2188_v8, %v4121_v50 }
 0xd65   : > { %v2200_v20 = vmul.f32 %v2199_v9, %v4121_v50 }
 0xd66   : > { %v2150_v60 = vadd.f32 0.0036580483, %v2149_v55  ;;  %v2161_v36 = vadd.f32 0.014752088, %v2160_v12  ;;  %v2190_v3 = vadd.f32 0.0036580483, %v2189_v56 }
 0xd67   : > { %v2201_v61 = vadd.f32 0.014752088, %v2200_v20 }
 0xd68   : > { %v2162_v57 = vmul.f32 %v2161_v36, %v2146_v54  ;;  %v2151_v7 = vmul.f32 %v2150_v60, %v2146_v54  ;;  %v2191_v1 = vmul.f32 %v2190_v3, %v4121_v50  ;;  %v2141_v60 = vmul.f32 0.5, %v4107_v52 }
 0xd69   : > { %v2202_v19 = vmul.f32 %v2201_v61, %v4121_v50  ;;  %v2142_v61 = vmul.f32 0.5, %v4109_v38 }
 0xd6a   : > { %v2163_v49 = vadd.f32 0.112945676, %v2162_v57  ;;  %v2152_v39 = vadd.f32 0.05243302, %v2151_v7  ;;  %v2192_v31 = vadd.f32 0.05243302, %v2191_v1 }
 0xd6b   : > { %v2203_v10 = vadd.f32 0.112945676, %v2202_v19  ;;  %v3310_v1 = vld [vmem:[%s4219_s14 + $0x38] sm:$0xff] }
 0xd6c   : > { %v2164_v11 = vmul.f32 %v2163_v49, %v2146_v54  ;;  %v2153_v41 = vmul.f32 %v2152_v39, %v2146_v54  ;;  %v2193_v14 = vmul.f32 %v2192_v31, %v4121_v50  ;;  %2489 = vmatpush.bf16.msrb.mxu2 %v3310_v1  ;;  %v3305_v31 = vld [vmem:[%s4219_s14 + $0x10] sm:$0xff] }
 0xd6d   : > { %v2204_v25 = vmul.f32 %v2203_v10, %v4121_v50 }
 0xd6e   : > { %v2165_v23 = vadd.f32 0.4994258, %v2164_v11  ;;  %v2154_v2 = vadd.f32 0.18741608, %v2153_v41  ;;  %v2194_v24 = vadd.f32 0.18741608, %v2193_v14 }
 0xd6f   : > { %v2205_v26 = vadd.f32 0.4994258, %v2204_v25  ;;  %v3303_v41 = vld [vmem:[%s4219_s14] sm:$0xff] }
 0xd70   : > { %v2166_v30 = vmul.f32 %v2165_v23, %v2146_v54  ;;  %v2155_v58 = vmul.f32 %v2154_v2, %v2146_v54  ;;  %v2195_v48 = vmul.f32 %v2194_v24, %v4121_v50  ;;  %v3309_v23 = vld [vmem:[%s4219_s14 + $0x30] sm:$0xff] }
 0xd71   : > { %v2206_v35 = vmul.f32 %v2205_v26, %v4121_v50  ;;  %2490 = vmatpush.bf16.msrb.mxu2 %v3309_v23  ;;  %v3307_v26 = vld [vmem:[%s4219_s14 + $0x20] sm:$0xff] }
 0xd72   : > { %v2167_v34 = vadd.f32 1.0, %v2166_v30  ;;  %v2156_v45 = vadd.f32 1.1283791, %v2155_v58  ;;  %v2196_v0 = vadd.f32 1.1283791, %v2195_v48  ;;  %v3306_v30 = vld [vmem:[%s4219_s14 + $0x18] sm:$0xff] }
 0xd73   : > { %v2207_v28 = vadd.f32 1.0, %v2206_v35  ;;  %v3304_v35 = vld [vmem:[%s4219_s14 + $0x8] sm:$0xff]  ;;  %v3375_v48 = vld [vmem:[%s4217_s12 + $0x1] ss:$0 sm:$0xff] }
 0xd74   : > { %3424 = vrcp.f32 %v2167_v34  ;;  %v2179_v21 = vand.u32 2147483648, %v2167_v34  ;;  %v2177_v43 = vand.u32 2147483647, %v2167_v34  ;;  %vm2173_vm10 = vweird.f32 %v2167_v34 }
 0xd75   : > { %3426 = vrcp.f32 %v2207_v28  ;;  %v2219_v44 = vand.u32 2147483648, %v2207_v28  ;;  %v2217_v53 = vand.u32 2147483647, %v2207_v28  ;;  %vm2213_vm12 = vweird.f32 %v2207_v28 }
 0xd76   : > { %v2180_v54 = vor.u32 1.1754944e-38, %v2179_v21  ;;  %v2157_v50 = vmul.f32 %v2156_v45, %v4112_v22  ;;  %vm2178_vm13 = vcmp.eq.f32.partialorder %v2177_v43, 8.507059e+37  ;;  %v2197_v9 = vmul.f32 %v2196_v0, %v4115_v27  ;;  %v3374_v27 = vld [vmem:[%s4214_s9 + $0x1] ss:$0 sm:$0xff] }
 0xd77   : > { %v2220_v6 = vor.u32 1.1754944e-38, %v2219_v44  ;;  %vm2218_vm15 = vcmp.eq.f32.partialorder %v2217_v53, 8.507059e+37 }
 0xd7a   : > { %v3425_v46 = vpop.eup %3424 }
 0xd7b   : > { %v3427_v33 = vpop.eup %3426  ;;  %v2169_v32 = vmul.f32 %v3425_v46, %v2167_v34  ;;  %vm2174_vm4 = vweird.f32 %v3425_v46 }
 0xd7c   : > { %v2209_v18 = vmul.f32 %v3427_v33, %v2207_v28  ;;  %vm2214_vm9 = vweird.f32 %v3427_v33  ;;  %vm2175_vm11 = vmor %vm2173_vm10, %vm2174_vm4 }
 0xd7d   : > { %v2170_v37 = vsub.f32 1.0, %v2169_v32  ;;  %vm2215_vm14 = vmor %vm2213_vm12, %vm2214_vm9 }
 0xd7e   : > { %v2210_v42 = vsub.f32 1.0, %v2209_v18 }
 0xd7f   : > { %v2171_v51 = vmul.f32 %v3425_v46, %v2170_v37 }
 0xd80   : > { %v2211_v4 = vmul.f32 %v3427_v33, %v2210_v42 }
 0xd81   : > { %v2172_v29 = vadd.f32 %v3425_v46, %v2171_v51 }
 0xd82   : > { %v2212_v5 = vadd.f32 %v3427_v33, %v2211_v4 }
 0xd83   : > { %v2176_v15 = vsel %vm2175_vm11, %v3425_v46, %v2172_v29 }
 0xd84   : > { %v2181_v8 = vsel %vm2178_vm13, %v2180_v54, %v2176_v15  ;;  %v2216_v55 = vsel %vm2215_vm14, %v3427_v33, %v2212_v5 }
 0xd85   : > { %v2182_v12 = vmul.f32 %v2181_v8, %v2157_v50  ;;  %v2221_v56 = vsel %vm2218_vm15, %v2220_v6, %v2216_v55 }
 0xd86   : > { %v2222_v13 = vmul.f32 %v2221_v56, %v2197_v9 }
 0xd87   : > { %v3086_v59 = vclamps-f32 %v2182_v12, 1.0 }
 0xd88   : > { %v3087_v20 = vclamps-f32 %v2222_v13, 1.0 }
 0xd89   : > { %v2225_v36 = vadd.f32 1.0, %v3086_v59 }
 0xd8a   : > { %v2226_v22 = vadd.f32 1.0, %v3087_v20 }
 0xd8b   : > { %v2227_v57 = vmul.f32 %v2225_v36, %v2141_v60 }
 0xd8c   : > { %v2228_v3 = vmul.f32 %v2226_v22, %v2142_v61 }
 0xd8d   : > { %v2229_v63 = vpack.c.bf16 %v2227_v57, %v2227_v57 }
 0xd8e   : > { %v2230_v47 = vpack.c.bf16 %v2228_v3, %v2228_v3 }
 0xd8f   : > { %2373 = vmatmul.bf16.vlgmr.msrb.gmra.mxu0 %v2229_v63 }
 0xd90   : > { %2386 = vmatmul.bf16.vlgmr.msrb.gmra.mxu1 %v2230_v47 }
 0xe0c   : > { %v2374_v19 = vpop.f32.mrf.mxu0 }
 0xe0d   : > { %v2375_v7 = vadd.f32 %v3374_v27, %v2374_v19  ;;  %v2387_v49 = vpop.f32.mrf.mxu1 }
 0xe0f   : > { %v2388_v10 = vadd.f32 %v2387_v49, %v2375_v7 }
 0xe11   : > { %v2391_v52 = vadd.f32 %v2388_v10, %v4100_v40  ;;  %v3308_v40 = vld [vmem:[%s4219_s14 + $0x28] sm:$0xff] }
 0xe12   : > { %2491 = vmatpush.bf16.msrb.mxu2 %v3308_v40  ;;  %v3556_v40 = vmov 64.0  }
 0xe13   : > { %2396 = vadd.xlane.f32.xlu1 %v2391_v52 }
 0xe14   : > { %v2376_v11 = vpop.f32.mrf.mxu0 }
 0xe15   : > { %v2389_v38 = vpop.f32.mrf.mxu1 }
 0xe16   : > { %2492 = vmatpush.bf16.msrb.mxu2 %v3307_v26 }
 0xe1a   : > { %2493 = vmatpush.bf16.msrb.mxu2 %v3306_v30 }
 0xe1e   : > { %2494 = vmatpush.bf16.msrb.mxu2 %v3305_v31 }
 0xe22   : > { %2495 = vmatpush.bf16.msrb.mxu2 %v3304_v35 }
 0xe26   : > { %2496 = vmatpush.bf16.msrb.mxu2 %v3303_v41 }
 0xe86   : > { %v2397_v16 = vpop.xlane.xlu1 %2396 }
 0xe87   : > { %v2398_v17 = vmul.f32 %v2397_v16, %v3917_v62 }
 0xe89   : > { %v2399_v25 = vsub.f32 %v2391_v52, %v2398_v17 }
 0xe8b   : > { %v2400_v39 = vmul.f32 %v2399_v25, %v2399_v25 }
 0xe8d   : > { %2401 = vadd.xlane.f32.xlu1 %v2400_v39 }
 0xf00   : > { %v2402_v34 = vpop.xlane.xlu1 %2401 }
 0xf01   : > { %v2403_v28 = vmul.f32 %v2402_v34, %v3917_v62  ;;  %v3376_v62 = vld [vmem:[%s4218_s13 + $0x1] ss:$0 sm:$0xff] }
 0xf03   : > { %v2404_v14 = vadd.f32 1e-05, %v2403_v28 }
 0xf05   : > { %3428 = vrsqrt.f32 %v2404_v14  ;;  %vm2411_vm6 = vweird.f32 %v2404_v14 }
 0xf0b   : > { %v3429_v2 = vpop.eup %3428 }
 0xf0c   : > { %v2406_v24 = vmul.f32 %v3429_v2, %v2404_v14  ;;  %vm2412_vm5 = vweird.f32 %v3429_v2 }
 0xf0d   : > { %vm2413_vm7 = vmor %vm2411_vm6, %vm2412_vm5 }
 0xf0e   : > { %v2407_v46 = vmul.f32 %v3429_v2, %v2406_v24 }
 0xf10   : > { %v2408_v58 = vmul.f32 0.5, %v2407_v46 }
 0xf12   : > { %v2409_v33 = vsub.f32 1.5, %v2408_v58  ;;  %v3314_v58 = vld [vmem:[%s4222_s17 + $0x18] sm:$0xff] }
 0xf13   : > { %2629 = vmatpush.bf16.msrb.mxu3 %v3314_v58 }
 0xf14   : > { %v2410_v32 = vmul.f32 %v3429_v2, %v2409_v33  ;;  %v3313_v33 = vld [vmem:[%s4222_s17 + $0x10] sm:$0xff] }
 0xf16   : > { %v2414_v18 = vsel %vm2413_vm7, %v3429_v2, %v2410_v32  ;;  %v3312_v32 = vld [vmem:[%s4222_s17 + $0x8] sm:$0xff] }
 0xf17   : > { %v2415_v37 = vmul.f32 %v2414_v18, %v2399_v25  ;;  %2630 = vmatpush.bf16.msrb.mxu3 %v3313_v33 }
 0xf19   : > { %v2419_v45 = vmul.f32 %v3375_v48, %v2415_v37  ;;  %v3311_v48 = vld [vmem:[%s4222_s17] sm:$0xff] }
 0xf1b   : > { %v2423_v21 = vadd.f32 %v3376_v62, %v2419_v45  ;;  %2631 = vmatpush.bf16.msrb.mxu3 %v3312_v32 }
 0xf1d   : > { %v2424_v42 = vpack.c.bf16 %v2423_v21, %v2423_v21 }
 0xf1f   : > { %2497 = vmatmul.bf16.vlgmr.msrb.gmra.mxu2 %v2424_v42  ;;  %2632 = vmatpush.bf16.msrb.mxu3 %v3311_v48 }
 0xfa2   : > { %v2498_v51 = vpop.f32.mrf.mxu2 }
 0xfa3   : > { %v2503_v43 = vmul.f32 0.70710677, %v2498_v51  ;;  %v2502_v17 = vmul.f32 0.5, %v2498_v51 }
 0xfa5   : > { %v2504_v44 = vmul.f32 %v2503_v43, %v2503_v43 }
 0xfa7   : > { %v2505_v0 = vmin.f32 %v2504_v44, 16.0 }
 0xfa9   : > { %v2506_v4 = vmul.f32 2.1237322e-06, %v2505_v0  ;;  %v2517_v53 = vmul.f32 3.8918573e-05, %v2505_v0 }
 0xfaa   : > { %v2500_v29 = vpop.f32.mrf.mxu2 }
 0xfab   : > { %v2507_v54 = vadd.f32 0.00028619796, %v2506_v4  ;;  %v2518_v5 = vadd.f32 0.001143296, %v2517_v53  ;;  %v3378_v29 = vld [vmem:[%s4242_s21] ss:$0 sm:$0xff] }
 0xfad   : > { %v2508_v50 = vmul.f32 %v2507_v54, %v2505_v0  ;;  %v2519_v15 = vmul.f32 %v2518_v5, %v2505_v0 }
 0xfaf   : > { %v2520_v6 = vadd.f32 0.014752088, %v2519_v15  ;;  %v2509_v8 = vadd.f32 0.0036580483, %v2508_v50  ;;  %v3379_v15 = vld [vmem:[%s4243_s26] ss:$0 sm:$0xff] }
 0xfb1   : > { %v2521_v9 = vmul.f32 %v2520_v6, %v2505_v0  ;;  %v2510_v12 = vmul.f32 %v2509_v8, %v2505_v0 }
 0xfb3   : > { %v2522_v55 = vadd.f32 0.112945676, %v2521_v9  ;;  %v2511_v59 = vadd.f32 0.05243302, %v2510_v12 }
 0xfb5   : > { %v2523_v56 = vmul.f32 %v2522_v55, %v2505_v0  ;;  %v2512_v36 = vmul.f32 %v2511_v59, %v2505_v0 }
 0xfb7   : > { %v2524_v13 = vadd.f32 0.4994258, %v2523_v56  ;;  %v2513_v61 = vadd.f32 0.18741608, %v2512_v36 }
 0xfb9   : > { %v2525_v20 = vmul.f32 %v2524_v13, %v2505_v0  ;;  %v2514_v57 = vmul.f32 %v2513_v61, %v2505_v0  ;;  %v3377_v0 = vld [vmem:[%s4220_s15] ss:$0 sm:$0xff] }
 0xfbb   : > { %v2526_v60 = vadd.f32 1.0, %v2525_v20  ;;  %v2515_v27 = vadd.f32 1.1283791, %v2514_v57 }
 0xfbd   : > { %3430 = vrcp.f32 %v2526_v60  ;;  %v2538_v47 = vand.u32 2147483648, %v2526_v60  ;;  %v2536_v7 = vand.u32 2147483647, %v2526_v60  ;;  %vm2532_vm0 = vweird.f32 %v2526_v60 }
 0xfbe   : > { %v2516_v52 = vmul.f32 %v2515_v27, %v2503_v43  ;;  %3432 = vrcp.f32 %v3556_v40 }
 0xfbf   : > { %v2539_v10 = vor.u32 1.1754944e-38, %v2538_v47  ;;  %vm2537_vm2 = vcmp.eq.f32.partialorder %v2536_v7, 8.507059e+37 }
 0xfc3   : > { %v3431_v22 = vpop.eup %3430 }
 0xfc4   : > { %v2528_v3 = vmul.f32 %v3431_v22, %v2526_v60  ;;  %vm2533_vm8 = vweird.f32 %v3431_v22  ;;  %v3433_v26 = vpop.eup %3432 }
 0xfc5   : > { %vm2534_vm1 = vmor %vm2532_vm0, %vm2533_vm8  ;;  %v2552_v30 = vmul.f32 64.0, %v3433_v26  ;;  %vm2556_vm4 = vweird.f32 %v3433_v26 }
 0xfc6   : > { %v2529_v63 = vsub.f32 1.0, %v2528_v3 }
 0xfc7   : > { %v2553_v31 = vsub.f32 1.0, %v2552_v30 }
 0xfc8   : > { %v2530_v19 = vmul.f32 %v3431_v22, %v2529_v63 }
 0xfc9   : > { %v2554_v35 = vmul.f32 %v3433_v26, %v2553_v31 }
 0xfca   : > { %v2531_v49 = vadd.f32 %v3431_v22, %v2530_v19 }
 0xfcb   : > { %v2555_v41 = vadd.f32 %v3433_v26, %v2554_v35 }
 0xfcc   : > { %v2535_v11 = vsel %vm2534_vm1, %v3431_v22, %v2531_v49 }
 0xfcd   : > { %v2540_v38 = vsel %vm2537_vm2, %v2539_v10, %v2535_v11  ;;  %v2557_v34 = vsel %vm2556_vm4, %v3433_v26, %v2555_v41 }
 0xfce   : > { %v2541_v1 = vmul.f32 %v2540_v38, %v2516_v52 }
 0xfd0   : > { %v3187_v16 = vclamps-f32 %v2541_v1, 1.0 }
 0xfd2   : > { %v2544_v25 = vadd.f32 1.0, %v3187_v16 }
 0xfd4   : > { %v2545_v39 = vmul.f32 %v2544_v25, %v2502_v17 }
 0xfd6   : > { %v2548_v23 = vsel %vm1151_vm3, %v2545_v39, 0.0 }
 0xfd7   : > { %2549 = vadd.xlane.f32.xlu1 %v2548_v23 }
0x104a   : > { %v2550_v28 = vpop.xlane.xlu1 %2549 }
0x104b   : > { %v2558_v14 = vmul.f32 %v2557_v34, %v2550_v28 }
0x104d   : > { %v2559_v2 = vsub.f32 %v2545_v39, %v2558_v14 }
0x104f   : > { %v2560_v24 = vmul.f32 %v2559_v2, %v2559_v2 }
0x1051   : > { %v2561_v46 = vsel %vm1151_vm3, %v2560_v24, 0.0 }
0x1052   : > { %2562 = vadd.xlane.f32.xlu0 %v2561_v46 }
0x10c5   : > { %v2563_v18 = vpop.xlane.xlu0 %2562 }
0x10c6   : > { %v2564_v37 = vmul.f32 %v2563_v18, %v2557_v34 }
0x10c8   : > { %v2565_v62 = vadd.f32 1e-05, %v2564_v37 }
0x10ca   : > { %3434 = vrsqrt.f32 %v2565_v62  ;;  %vm2572_vm10 = vweird.f32 %v2565_v62 }
0x10d0   : > { %v3435_v45 = vpop.eup %3434 }
0x10d1   : > { %v2567_v21 = vmul.f32 %v3435_v45, %v2565_v62  ;;  %vm2573_vm9 = vweird.f32 %v3435_v45 }
0x10d2   : > { %vm2574_vm11 = vmor %vm2572_vm10, %vm2573_vm9 }
0x10d3   : > { %v2568_v42 = vmul.f32 %v3435_v45, %v2567_v21 }
0x10d5   : > { %v2569_v51 = vmul.f32 0.5, %v2568_v42 }
0x10d7   : > { %v2570_v43 = vsub.f32 1.5, %v2569_v51 }
0x10d9   : > { %v2571_v44 = vmul.f32 %v3435_v45, %v2570_v43 }
0x10db   : > { %v2575_v4 = vsel %vm2574_vm11, %v3435_v45, %v2571_v44 }
0x10dc   : > { %v2576_v53 = vmul.f32 %v2575_v4, %v2559_v2 }
0x10de   : > { %v2580_v54 = vmul.f32 %v3377_v0, %v2576_v53 }
0x10e0   : > { %v2584_v5 = vadd.f32 %v3378_v29, %v2580_v54 }
0x10e2   : > { %v2585_v50 = vpack.c.bf16 %v2584_v5, %v2584_v5 }
0x10e4   : > { %3204 = vmatmul.msk.bf16.vlgmr.msrb.gmra.mxu3 %vm1151_vm3, %v2585_v50 }
0x1167   : > { %v2634_v6 = vpop.f32.mrf.mxu3 }
0x1168   : > { %v2635_v8 = vadd.f32 %v3379_v15, %v2634_v6 }
0x116a   : > { %2638 = vst [vmem:[%s661_s24] sm:$0xff] %v2635_v8 }
0x116f   : > { %v2636_v9 = vpop.f32.mrf.mxu3 }
0x1170 PF: > { %s4245_s25 = sld [smem:[#allocation9_spill]] }
0x1176   : > { %s31_s0 = sadd.s32 1, %s4245_s25  }
0x1177   : > { %p28_p7 = scmp.ge.s32.totalorder %s31_s0, 4  }
0x1179   :  { %30 = sbr.rel (!%p28_p7) target bundleno = 11 (0xb), region = 150 }
0x117e   :  { %2658 = vsyncpa [#allocation3], 1 }
0x117f   :  { %2660 = vsyncpa [#allocation3 + $0x1], 1 }
0x1180   :  { %2661 = vsyncpa [#allocation5], 1 }

</bundles_post_ra>
